<compile_context>
chip_gen: v6e
topology: v6e:2x2x1
jax: 0.10.0
libtpu: 0.0.40
codegen_flags: <defaults>
</compile_context>

<pallas_src>
import functools

import jax
import jax.numpy as jnp
from jax import lax
from jax.experimental import pallas as pl
from jax.experimental.pallas import tpu as pltpu


_LANE = 128  # vreg lane width; hidden/gates/output chunks padded to this.


def _crnn_kernel(x_ref, wenc_ref, benc_ref, wmap_ref, bmap_ref,
                 wih_ref, bih_ref, wcomb_ref, bcomb_ref, fids_ref, *, t_total):
    """Encoder + map_first + fused GRU decode recurrence in one kernel."""
    B = x_ref.shape[0]
    Hp = wcomb_ref.shape[0]          # padded hidden size (multiple of 128)
    G = 3 * Hp                       # width of one (r|z|n) gate block
    CHUNK = _LANE
    n_chunks = fids_ref.shape[2] // CHUNK   # output time axis is padded

    x = x_ref[...]                                                   # (B, F)

    # encoder(x): h0 = tanh(x @ W_enc + b_enc); padded hidden cols stay 0.
    h0 = jnp.tanh(
        jnp.dot(x, wenc_ref[...], preferred_element_type=jnp.float32)
        + benc_ref[...])                                             # (B, Hp)

    # map_first(x): initial decoder input (= fids[:, 0, :]).
    inp0 = (jnp.dot(x, wmap_ref[...], preferred_element_type=jnp.float32)
            + bmap_ref[...])                                         # (B, 2)

    # Hoisted broadcasts (JAX does not CSE broadcast_in_dim inside the loop).
    bias = jnp.broadcast_to(bcomb_ref[...], (B, G + CHUNK))      # (B, 3Hp+128)
    wih_r0 = jnp.broadcast_to(wih_ref[0:1, :], (B, G))
    wih_r1 = jnp.broadcast_to(wih_ref[1:2, :], (B, G))
    bih_b = jnp.broadcast_to(bih_ref[...], (B, G))

    def gi_from_inp(inp):
        # decoder input (B, 2) -> input gate pre-activation on the VPU.
        # Contraction dim is 2, so no MXU round trip, and it preserves the
        # exact two-step f32 composition of the reference (no weight fold).
        return inp[:, 0:1] * wih_r0 + inp[:, 1:2] * wih_r1 + bih_b

    # Initial gate pre-activations (fid lanes of combo0 are discarded).
    combo0 = (jnp.dot(h0, wcomb_ref[...], preferred_element_type=jnp.float32)
              + bias)
    gh0 = combo0[:, 0:G]                                             # (B, 3Hp)
    gi0 = gi_from_inp(inp0)                                          # (B, 3Hp)

    # Rolling 128-lane output chunk; one lane-tile of select per step.
    lane_idx = lax.broadcasted_iota(jnp.int32, (B, 2, CHUNK), 2)

    def step(t, carry, chunk_base):
        h, gi, gh, acc = carry
        # GRU cell, PyTorch gate order (r, z, n); slices are vreg-aligned.
        r = jax.nn.sigmoid(gi[:, 0:Hp] + gh[:, 0:Hp])
        z = jax.nn.sigmoid(gi[:, Hp:2 * Hp] + gh[:, Hp:2 * Hp])
        n = jnp.tanh(gi[:, 2 * Hp:G] + r * gh[:, 2 * Hp:G])
        h_new = (1.0 - z) * n + z * h

        # Single MXU matmul per step: [gh_next | fid] = h_new @ [w_hh|w_fid]+b.
        combo = (jnp.dot(h_new, wcomb_ref[...],
                         preferred_element_type=jnp.float32) + bias)
        gh_new = combo[:, 0:G]
        fid = combo[:, G:G + 2]                                      # (B, 2)
        gi_new = gi_from_inp(fid)                                    # VPU only

        acc = jnp.where(lane_idx == (t + 1 - chunk_base), fid[:, :, None], acc)
        return h_new, gi_new, gh_new, acc

    h, gi, gh = h0, gi0, gh0
    for c in range(n_chunks):                    # static Python chunk loop
        base = c * CHUNK
        if c == 0:
            acc = jnp.where(lane_idx == 0, inp0[:, :, None],
                            jnp.zeros((B, 2, CHUNK), jnp.float32))
            t_start = 0
        else:
            acc = jnp.zeros((B, 2, CHUNK), jnp.float32)
            t_start = base - 1
        # step t writes output time t+1; this chunk covers times [base, base+128)
        t_stop = min(t_total - 1, base + CHUNK - 1)
        steps = t_stop - t_start
        if steps > 0:
            unroll = True if steps <= 64 else 8   # bounded unroll for long T
            body = lambda t, carry, _b=base: step(t, carry, _b)
            h, gi, gh, acc = lax.fori_loop(t_start, t_stop, body,
                                           (h, gi, gh, acc), unroll=unroll)
        # Aligned, unmasked 128-lane slab store per chunk.
        fids_ref[:, :, base:base + CHUNK] = acc


def _round_up(n, m):
    return ((n + m - 1) // m) * m


def _pad_gate_cols(w, h, hp):
    """Pad each of the 3 GRU gate blocks (r|z|n) along the last axis h -> hp."""
    pad = [(0, 0)] * (w.ndim - 1) + [(0, hp - h)]
    parts = [jnp.pad(w[..., g * h:(g + 1) * h], pad) for g in range(3)]
    return jnp.concatenate(parts, axis=-1)


def _fuse_params(params):
    """Pad hidden dim to a lane multiple and build the per-step weight slab.

    W_comb = [ w_hh | w_fid ] -> (Hp, 3*Hp + 128): one matmul per decode step
    yields next-step gh and the fid; gi_next is recomputed on the VPU from fid
    inside the kernel.  Padding is exact: padded hidden units stay identically
    zero through the recurrence.
    """
    H = params["w_enc"].shape[1]
    Hp = _round_up(H, _LANE)

    w_enc = jnp.pad(params["w_enc"], ((0, 0), (0, Hp - H)))
    b_enc = jnp.pad(params["b_enc"], ((0, 0), (0, Hp - H)))
    w_map, b_map = params["w_map"], params["b_map"]

    w_ih = _pad_gate_cols(params["w_ih"], H, Hp)                    # (2, 3Hp)
    b_ih = _pad_gate_cols(params["b_ih"], H, Hp)                    # (1, 3Hp)
    w_hh = jnp.pad(_pad_gate_cols(params["w_hh"], H, Hp),
                   ((0, Hp - H), (0, 0)))                           # (Hp, 3Hp)
    b_hh = _pad_gate_cols(params["b_hh"], H, Hp)                    # (1, 3Hp)
    w_out = jnp.pad(params["w_out"], ((0, Hp - H), (0, 0)))         # (Hp, 2)
    b_out = params["b_out"]                                         # (1, 2)

    w_fid = jnp.pad(w_out, ((0, 0), (0, _LANE - 2)))                # (Hp, 128)
    b_fid = jnp.pad(b_out, ((0, 0), (0, _LANE - 2)))                # (1, 128)

    w_comb = jnp.concatenate([w_hh, w_fid], axis=1)                 # (Hp,3Hp+128)
    b_comb = jnp.concatenate([b_hh, b_fid], axis=1)                 # (1, 3Hp+128)
    return w_enc, b_enc, w_map, b_map, w_ih, b_ih, w_comb, b_comb


def crnn_forward(x, y, params, x_len, teach_force=0.0):
    """x: (B, 1, F_in) or (B, F_in); y: (B, x_len, 2) (unused, teach_force=0)."""
    del y, teach_force  # model-output path only (see TODO above)
    if x.ndim == 3:
        x = x[:, 0, :]
    B = x.shape[0]

    w_enc, b_enc, w_map, b_map, w_ih, b_ih, w_comb, b_comb = _fuse_params(params)

    args = (x.astype(jnp.float32), w_enc, b_enc, w_map, b_map,
            w_ih, b_ih, w_comb, b_comb)

    # Pad the time axis to a lane multiple so every in-kernel store is a full,
    # unmasked 128-lane slab; wrapper slices back to x_len.
    t_pad = _round_up(max(int(x_len), 1), _LANE)

    # Explicit VMEM budget: weights + inputs + padded output, with headroom.
    in_bytes = sum(int(a.size) * a.dtype.itemsize for a in args)
    out_bytes = B * 2 * t_pad * 4
    vmem_limit = int(min(max(4 * (in_bytes + out_bytes) + (4 << 20), 16 << 20),
                         64 << 20))

    vmem = pl.BlockSpec(memory_space=pltpu.MemorySpace.VMEM)
    kernel = functools.partial(_crnn_kernel, t_total=int(x_len))

    # B=2 is latency-bound -> single-core, grid-less call.
    # TODO(synk): for large B on v7x, add a batch grid axis with
    #             dimension_semantics=("parallel",) to use both TensorCores.
    fids_b2t = pl.pallas_call(
        kernel,
        out_shape=jax.ShapeDtypeStruct((B, 2, t_pad), jnp.float32),
        in_specs=[vmem] * len(args),
        out_specs=vmem,
        compiler_params=pltpu.CompilerParams(vmem_limit_bytes=vmem_limit),
    )(*args)

    # (B, 2, t_pad) -> (B, xLen, 2), matching the PyTorch `fids` tensor.
    return jnp.transpose(fids_b2t[:, :, :x_len], (0, 2, 1))


def init_params(key, f_in, hidden):
    ks = jax.random.split(key, 11)
    s = 0.1
    return {
        "w_enc": s * jax.random.normal(ks[0], (f_in, hidden), jnp.float32),
        "b_enc": s * jax.random.normal(ks[1], (1, hidden), jnp.float32),
        "w_map": s * jax.random.normal(ks[2], (f_in, 2), jnp.float32),
        "b_map": s * jax.random.normal(ks[3], (1, 2), jnp.float32),
        "w_ih":  s * jax.random.normal(ks[4], (2, 3 * hidden), jnp.float32),
        "w_hh":  s * jax.random.normal(ks[5], (hidden, 3 * hidden), jnp.float32),
        "b_ih":  s * jax.random.normal(ks[6], (1, 3 * hidden), jnp.float32),
        "b_hh":  s * jax.random.normal(ks[7], (1, 3 * hidden), jnp.float32),
        "w_out": s * jax.random.normal(ks[8], (hidden, 2), jnp.float32),
        "b_out": s * jax.random.normal(ks[9], (1, 2), jnp.float32),
    }


def _reference_forward(x, params, x_len):
    """Pure-JAX reference of the same (unfused, unpadded) semantics."""
    if x.ndim == 3:
        x = x[:, 0, :]
    H = params["w_enc"].shape[1]
    hidden = jnp.tanh(x @ params["w_enc"] + params["b_enc"])
    inp = x @ params["w_map"] + params["b_map"]
    fids = [inp]
    for _ in range(x_len - 1):
        gi = inp @ params["w_ih"] + params["b_ih"]
        gh = hidden @ params["w_hh"] + params["b_hh"]
        r = jax.nn.sigmoid(gi[:, :H] + gh[:, :H])
        z = jax.nn.sigmoid(gi[:, H:2 * H] + gh[:, H:2 * H])
        n = jnp.tanh(gi[:, 2 * H:] + r * gh[:, 2 * H:])
        hidden = (1.0 - z) * n + z * hidden
        inp = hidden @ params["w_out"] + params["b_out"]
        fids.append(inp)
    return jnp.stack(fids, axis=1)


if __name__ == "__main__":
    B, F_IN, H, X_LEN = 2, 4, 32, 8

    key = jax.random.PRNGKey(0)
    k_x, k_y, k_p = jax.random.split(key, 3)
    x = jax.random.normal(k_x, (B, 1, F_IN), jnp.float32)
    y = jax.random.normal(k_y, (B, X_LEN, 2), jnp.float32)   # unused (tf=0.0)
    params = init_params(k_p, F_IN, H)

    fids = crnn_forward(x, y, params, X_LEN, teach_force=0.0)
    fids = jax.block_until_ready(fids)

    ref = _reference_forward(x, params, X_LEN)
    assert fids.shape == (B, X_LEN, 2), fids.shape
    # Both kernel and reference run f32 matmuls at default TPU (bf16-pass)
    # precision; tolerance covers the accumulated per-step rounding delta.
    assert jnp.allclose(fids, ref, atol=5e-3, rtol=5e-3), "mismatch vs reference"

    print("KERNEL_OK")
</pallas_src>

<mosaic_0001>
module attributes {stable_mosaic.version = 11 : i64} {
  func.func @_crnn_kernel(%arg0: memref<2x4xf32, #tpu.memory_space<vmem>>, %arg1: memref<4x128xf32, #tpu.memory_space<vmem>>, %arg2: memref<1x128xf32, #tpu.memory_space<vmem>>, %arg3: memref<4x2xf32, #tpu.memory_space<vmem>>, %arg4: memref<1x2xf32, #tpu.memory_space<vmem>>, %arg5: memref<2x384xf32, #tpu.memory_space<vmem>>, %arg6: memref<1x384xf32, #tpu.memory_space<vmem>>, %arg7: memref<128x512xf32, #tpu.memory_space<vmem>>, %arg8: memref<1x512xf32, #tpu.memory_space<vmem>>, %arg9: memref<2x2x128xf32, #tpu.memory_space<vmem>>) attributes {dimension_semantics = [], scalar_prefetch = 0 : i64, scratch_operands = 0 : i64, tpu.core_type = #tpu.core_type<tc>} {
    %c0 = arith.constant 0 : index
    %c0_0 = arith.constant 0 : index
    %0 = vector.load %arg0[%c0, %c0_0] : memref<2x4xf32, #tpu.memory_space<vmem>>, vector<2x4xf32>
    %c0_1 = arith.constant 0 : index
    %c0_2 = arith.constant 0 : index
    %1 = vector.load %arg1[%c0_1, %c0_2] : memref<4x128xf32, #tpu.memory_space<vmem>>, vector<4x128xf32>
    %cst = arith.constant dense<0.000000e+00> : vector<2x128xf32>
    %2 = tpu.matmul %0, %1, %cst {dimension_numbers = #tpu.dot_dimension_numbers<[1], [0], [0], [1], [0, 0, 1, 1], [], []>} : vector<2x4xf32>, vector<4x128xf32>, vector<2x128xf32> -> vector<2x128xf32>
    %c0_3 = arith.constant 0 : index
    %c0_4 = arith.constant 0 : index
    %3 = vector.load %arg2[%c0_3, %c0_4] : memref<1x128xf32, #tpu.memory_space<vmem>>, vector<1x128xf32>
    %4 = vector.broadcast %3 : vector<1x128xf32> to vector<2x128xf32>
    %5 = arith.addf %2, %4 : vector<2x128xf32>
    %6 = math.tanh %5 : vector<2x128xf32>
    %c0_5 = arith.constant 0 : index
    %c0_6 = arith.constant 0 : index
    %7 = vector.load %arg3[%c0_5, %c0_6] : memref<4x2xf32, #tpu.memory_space<vmem>>, vector<4x2xf32>
    %cst_7 = arith.constant dense<0.000000e+00> : vector<2x2xf32>
    %8 = tpu.matmul %0, %7, %cst_7 {dimension_numbers = #tpu.dot_dimension_numbers<[1], [0], [0], [1], [0, 0, 1, 1], [], []>} : vector<2x4xf32>, vector<4x2xf32>, vector<2x2xf32> -> vector<2x2xf32>
    %c0_8 = arith.constant 0 : index
    %c0_9 = arith.constant 0 : index
    %9 = vector.load %arg4[%c0_8, %c0_9] : memref<1x2xf32, #tpu.memory_space<vmem>>, vector<1x2xf32>
    %10 = vector.broadcast %9 : vector<1x2xf32> to vector<2x2xf32>
    %11 = arith.addf %8, %10 : vector<2x2xf32>
    %c0_10 = arith.constant 0 : index
    %c0_11 = arith.constant 0 : index
    %12 = vector.load %arg8[%c0_10, %c0_11] : memref<1x512xf32, #tpu.memory_space<vmem>>, vector<1x512xf32>
    %13 = vector.shape_cast %12 : vector<1x512xf32> to vector<1x512xf32>
    %14 = vector.broadcast %13 : vector<1x512xf32> to vector<2x512xf32>
    %c0_12 = arith.constant 0 : index
    %c0_13 = arith.constant 0 : index
    %15 = vector.load %arg5[%c0_12, %c0_13] : memref<2x384xf32, #tpu.memory_space<vmem>>, vector<1x384xf32>
    %16 = vector.shape_cast %15 : vector<1x384xf32> to vector<1x384xf32>
    %17 = vector.broadcast %16 : vector<1x384xf32> to vector<2x384xf32>
    %c1 = arith.constant 1 : index
    %c0_14 = arith.constant 0 : index
    %18 = vector.load %arg5[%c1, %c0_14] : memref<2x384xf32, #tpu.memory_space<vmem>>, vector<1x384xf32>
    %19 = vector.shape_cast %18 : vector<1x384xf32> to vector<1x384xf32>
    %20 = vector.broadcast %19 : vector<1x384xf32> to vector<2x384xf32>
    %c0_15 = arith.constant 0 : index
    %c0_16 = arith.constant 0 : index
    %21 = vector.load %arg6[%c0_15, %c0_16] : memref<1x384xf32, #tpu.memory_space<vmem>>, vector<1x384xf32>
    %22 = vector.shape_cast %21 : vector<1x384xf32> to vector<1x384xf32>
    %23 = vector.broadcast %22 : vector<1x384xf32> to vector<2x384xf32>
    %c0_17 = arith.constant 0 : index
    %c0_18 = arith.constant 0 : index
    %24 = vector.load %arg7[%c0_17, %c0_18] : memref<128x512xf32, #tpu.memory_space<vmem>>, vector<128x512xf32>
    %cst_19 = arith.constant dense<0.000000e+00> : vector<2x512xf32>
    %25 = tpu.matmul %6, %24, %cst_19 {dimension_numbers = #tpu.dot_dimension_numbers<[1], [0], [0], [1], [0, 0, 1, 1], [], []>} : vector<2x128xf32>, vector<128x512xf32>, vector<2x512xf32> -> vector<2x512xf32>
    %26 = arith.addf %25, %14 : vector<2x512xf32>
    %27 = vector.extract_strided_slice %26 {offsets = [0, 0], sizes = [2, 384], strides = [1, 1]} : vector<2x512xf32> to vector<2x384xf32>
    %28 = vector.extract_strided_slice %11 {offsets = [0, 0], sizes = [2, 1], strides = [1, 1]} : vector<2x2xf32> to vector<2x1xf32>
    %29 = vector.broadcast %28 : vector<2x1xf32> to vector<2x384xf32>
    %30 = arith.mulf %29, %17 : vector<2x384xf32>
    %31 = vector.extract_strided_slice %11 {offsets = [0, 1], sizes = [2, 1], strides = [1, 1]} : vector<2x2xf32> to vector<2x1xf32>
    %32 = vector.broadcast %31 : vector<2x1xf32> to vector<2x384xf32>
    %33 = arith.mulf %32, %20 : vector<2x384xf32>
    %34 = arith.addf %30, %33 : vector<2x384xf32>
    %35 = arith.addf %34, %23 : vector<2x384xf32>
    %36 = tpu.iota {dimensions = array<i32: 2>} : vector<2x2x128xi32>
    %c0_i32 = arith.constant 0 : i32
    %37 = vector.broadcast %c0_i32 : i32 to vector<2x2x128xi32>
    %38 = arith.cmpi eq, %36, %37 : vector<2x2x128xi32>
    %39 = vector.shape_cast %11 : vector<2x2xf32> to vector<2x2x1xf32>
    %cst_20 = arith.constant 0.000000e+00 : f32
    %40 = vector.broadcast %cst_20 : f32 to vector<2x2x128xf32>
    %41 = vector.shape_cast %39 : vector<2x2x1xf32> to vector<2x2x1xf32>
    %42 = vector.broadcast %41 : vector<2x2x1xf32> to vector<2x2x128xf32>
    %43 = arith.select %38, %42, %40 : vector<2x2x128xi1>, vector<2x2x128xf32>
    %c0_i32_21 = arith.constant 0 : i32
    %44 = vector.extract_strided_slice %35 {offsets = [0, 0], sizes = [2, 128], strides = [1, 1]} : vector<2x384xf32> to vector<2x128xf32>
    %45 = vector.extract_strided_slice %27 {offsets = [0, 0], sizes = [2, 128], strides = [1, 1]} : vector<2x384xf32> to vector<2x128xf32>
    %46 = arith.addf %44, %45 : vector<2x128xf32>
    %47 = arith.negf %46 : vector<2x128xf32>
    %48 = math.exp %47 : vector<2x128xf32>
    %cst_22 = arith.constant 1.000000e+00 : f32
    %49 = vector.broadcast %cst_22 : f32 to vector<2x128xf32>
    %50 = arith.addf %49, %48 : vector<2x128xf32>
    %51 = arith.divf %49, %50 : vector<2x128xf32>
    %52 = vector.extract_strided_slice %35 {offsets = [0, 128], sizes = [2, 128], strides = [1, 1]} : vector<2x384xf32> to vector<2x128xf32>
    %53 = vector.extract_strided_slice %27 {offsets = [0, 128], sizes = [2, 128], strides = [1, 1]} : vector<2x384xf32> to vector<2x128xf32>
    %54 = arith.addf %52, %53 : vector<2x128xf32>
    %55 = arith.negf %54 : vector<2x128xf32>
    %56 = math.exp %55 : vector<2x128xf32>
    %cst_23 = arith.constant 1.000000e+00 : f32
    %57 = vector.broadcast %cst_23 : f32 to vector<2x128xf32>
    %58 = arith.addf %57, %56 : vector<2x128xf32>
    %59 = arith.divf %57, %58 : vector<2x128xf32>
    %60 = vector.extract_strided_slice %35 {offsets = [0, 256], sizes = [2, 128], strides = [1, 1]} : vector<2x384xf32> to vector<2x128xf32>
    %61 = vector.extract_strided_slice %27 {offsets = [0, 256], sizes = [2, 128], strides = [1, 1]} : vector<2x384xf32> to vector<2x128xf32>
    %62 = arith.mulf %51, %61 : vector<2x128xf32>
    %63 = arith.addf %60, %62 : vector<2x128xf32>
    %64 = math.tanh %63 : vector<2x128xf32>
    %cst_24 = arith.constant 1.000000e+00 : f32
    %65 = vector.broadcast %cst_24 : f32 to vector<2x128xf32>
    %66 = arith.subf %65, %59 : vector<2x128xf32>
    %67 = arith.mulf %66, %64 : vector<2x128xf32>
    %68 = arith.mulf %59, %6 : vector<2x128xf32>
    %69 = arith.addf %67, %68 : vector<2x128xf32>
    %c0_25 = arith.constant 0 : index
    %c0_26 = arith.constant 0 : index
    %70 = vector.load %arg7[%c0_25, %c0_26] : memref<128x512xf32, #tpu.memory_space<vmem>>, vector<128x512xf32>
    %cst_27 = arith.constant dense<0.000000e+00> : vector<2x512xf32>
    %71 = tpu.matmul %69, %70, %cst_27 {dimension_numbers = #tpu.dot_dimension_numbers<[1], [0], [0], [1], [0, 0, 1, 1], [], []>} : vector<2x128xf32>, vector<128x512xf32>, vector<2x512xf32> -> vector<2x512xf32>
    %72 = arith.addf %71, %14 : vector<2x512xf32>
    %73 = vector.extract_strided_slice %72 {offsets = [0, 0], sizes = [2, 384], strides = [1, 1]} : vector<2x512xf32> to vector<2x384xf32>
    %74 = vector.extract_strided_slice %72 {offsets = [0, 384], sizes = [2, 2], strides = [1, 1]} : vector<2x512xf32> to vector<2x2xf32>
    %75 = vector.extract_strided_slice %74 {offsets = [0, 0], sizes = [2, 1], strides = [1, 1]} : vector<2x2xf32> to vector<2x1xf32>
    %76 = vector.broadcast %75 : vector<2x1xf32> to vector<2x384xf32>
    %77 = arith.mulf %76, %17 : vector<2x384xf32>
    %78 = vector.extract_strided_slice %74 {offsets = [0, 1], sizes = [2, 1], strides = [1, 1]} : vector<2x2xf32> to vector<2x1xf32>
    %79 = vector.broadcast %78 : vector<2x1xf32> to vector<2x384xf32>
    %80 = arith.mulf %79, %20 : vector<2x384xf32>
    %81 = arith.addf %77, %80 : vector<2x384xf32>
    %82 = arith.addf %81, %23 : vector<2x384xf32>
    %c1_i32 = arith.constant 1 : i32
    %83 = arith.addi %c0_i32_21, %c1_i32 : i32
    %c0_i32_28 = arith.constant 0 : i32
    %84 = arith.subi %83, %c0_i32_28 : i32
    %85 = vector.broadcast %84 : i32 to vector<2x2x128xi32>
    %86 = arith.cmpi eq, %36, %85 : vector<2x2x128xi32>
    %87 = vector.shape_cast %74 : vector<2x2xf32> to vector<2x2x1xf32>
    %88 = vector.shape_cast %87 : vector<2x2x1xf32> to vector<2x2x1xf32>
    %89 = vector.broadcast %88 : vector<2x2x1xf32> to vector<2x2x128xf32>
    %90 = arith.select %86, %89, %43 : vector<2x2x128xi1>, vector<2x2x128xf32>
    %c1_i32_29 = arith.constant 1 : i32
    %91 = vector.extract_strided_slice %82 {offsets = [0, 0], sizes = [2, 128], strides = [1, 1]} : vector<2x384xf32> to vector<2x128xf32>
    %92 = vector.extract_strided_slice %73 {offsets = [0, 0], sizes = [2, 128], strides = [1, 1]} : vector<2x384xf32> to vector<2x128xf32>
    %93 = arith.addf %91, %92 : vector<2x128xf32>
    %94 = arith.negf %93 : vector<2x128xf32>
    %95 = math.exp %94 : vector<2x128xf32>
    %cst_30 = arith.constant 1.000000e+00 : f32
    %96 = vector.broadcast %cst_30 : f32 to vector<2x128xf32>
    %97 = arith.addf %96, %95 : vector<2x128xf32>
    %98 = arith.divf %96, %97 : vector<2x128xf32>
    %99 = vector.extract_strided_slice %82 {offsets = [0, 128], sizes = [2, 128], strides = [1, 1]} : vector<2x384xf32> to vector<2x128xf32>
    %100 = vector.extract_strided_slice %73 {offsets = [0, 128], sizes = [2, 128], strides = [1, 1]} : vector<2x384xf32> to vector<2x128xf32>
    %101 = arith.addf %99, %100 : vector<2x128xf32>
    %102 = arith.negf %101 : vector<2x128xf32>
    %103 = math.exp %102 : vector<2x128xf32>
    %cst_31 = arith.constant 1.000000e+00 : f32
    %104 = vector.broadcast %cst_31 : f32 to vector<2x128xf32>
    %105 = arith.addf %104, %103 : vector<2x128xf32>
    %106 = arith.divf %104, %105 : vector<2x128xf32>
    %107 = vector.extract_strided_slice %82 {offsets = [0, 256], sizes = [2, 128], strides = [1, 1]} : vector<2x384xf32> to vector<2x128xf32>
    %108 = vector.extract_strided_slice %73 {offsets = [0, 256], sizes = [2, 128], strides = [1, 1]} : vector<2x384xf32> to vector<2x128xf32>
    %109 = arith.mulf %98, %108 : vector<2x128xf32>
    %110 = arith.addf %107, %109 : vector<2x128xf32>
    %111 = math.tanh %110 : vector<2x128xf32>
    %cst_32 = arith.constant 1.000000e+00 : f32
    %112 = vector.broadcast %cst_32 : f32 to vector<2x128xf32>
    %113 = arith.subf %112, %106 : vector<2x128xf32>
    %114 = arith.mulf %113, %111 : vector<2x128xf32>
    %115 = arith.mulf %106, %69 : vector<2x128xf32>
    %116 = arith.addf %114, %115 : vector<2x128xf32>
    %c0_33 = arith.constant 0 : index
    %c0_34 = arith.constant 0 : index
    %117 = vector.load %arg7[%c0_33, %c0_34] : memref<128x512xf32, #tpu.memory_space<vmem>>, vector<128x512xf32>
    %cst_35 = arith.constant dense<0.000000e+00> : vector<2x512xf32>
    %118 = tpu.matmul %116, %117, %cst_35 {dimension_numbers = #tpu.dot_dimension_numbers<[1], [0], [0], [1], [0, 0, 1, 1], [], []>} : vector<2x128xf32>, vector<128x512xf32>, vector<2x512xf32> -> vector<2x512xf32>
    %119 = arith.addf %118, %14 : vector<2x512xf32>
    %120 = vector.extract_strided_slice %119 {offsets = [0, 0], sizes = [2, 384], strides = [1, 1]} : vector<2x512xf32> to vector<2x384xf32>
    %121 = vector.extract_strided_slice %119 {offsets = [0, 384], sizes = [2, 2], strides = [1, 1]} : vector<2x512xf32> to vector<2x2xf32>
    %122 = vector.extract_strided_slice %121 {offsets = [0, 0], sizes = [2, 1], strides = [1, 1]} : vector<2x2xf32> to vector<2x1xf32>
    %123 = vector.broadcast %122 : vector<2x1xf32> to vector<2x384xf32>
    %124 = arith.mulf %123, %17 : vector<2x384xf32>
    %125 = vector.extract_strided_slice %121 {offsets = [0, 1], sizes = [2, 1], strides = [1, 1]} : vector<2x2xf32> to vector<2x1xf32>
    %126 = vector.broadcast %125 : vector<2x1xf32> to vector<2x384xf32>
    %127 = arith.mulf %126, %20 : vector<2x384xf32>
    %128 = arith.addf %124, %127 : vector<2x384xf32>
    %129 = arith.addf %128, %23 : vector<2x384xf32>
    %c1_i32_36 = arith.constant 1 : i32
    %130 = arith.addi %c1_i32_29, %c1_i32_36 : i32
    %c0_i32_37 = arith.constant 0 : i32
    %131 = arith.subi %130, %c0_i32_37 : i32
    %132 = vector.broadcast %131 : i32 to vector<2x2x128xi32>
    %133 = arith.cmpi eq, %36, %132 : vector<2x2x128xi32>
    %134 = vector.shape_cast %121 : vector<2x2xf32> to vector<2x2x1xf32>
    %135 = vector.shape_cast %134 : vector<2x2x1xf32> to vector<2x2x1xf32>
    %136 = vector.broadcast %135 : vector<2x2x1xf32> to vector<2x2x128xf32>
    %137 = arith.select %133, %136, %90 : vector<2x2x128xi1>, vector<2x2x128xf32>
    %c2_i32 = arith.constant 2 : i32
    %138 = vector.extract_strided_slice %129 {offsets = [0, 0], sizes = [2, 128], strides = [1, 1]} : vector<2x384xf32> to vector<2x128xf32>
    %139 = vector.extract_strided_slice %120 {offsets = [0, 0], sizes = [2, 128], strides = [1, 1]} : vector<2x384xf32> to vector<2x128xf32>
    %140 = arith.addf %138, %139 : vector<2x128xf32>
    %141 = arith.negf %140 : vector<2x128xf32>
    %142 = math.exp %141 : vector<2x128xf32>
    %cst_38 = arith.constant 1.000000e+00 : f32
    %143 = vector.broadcast %cst_38 : f32 to vector<2x128xf32>
    %144 = arith.addf %143, %142 : vector<2x128xf32>
    %145 = arith.divf %143, %144 : vector<2x128xf32>
    %146 = vector.extract_strided_slice %129 {offsets = [0, 128], sizes = [2, 128], strides = [1, 1]} : vector<2x384xf32> to vector<2x128xf32>
    %147 = vector.extract_strided_slice %120 {offsets = [0, 128], sizes = [2, 128], strides = [1, 1]} : vector<2x384xf32> to vector<2x128xf32>
    %148 = arith.addf %146, %147 : vector<2x128xf32>
    %149 = arith.negf %148 : vector<2x128xf32>
    %150 = math.exp %149 : vector<2x128xf32>
    %cst_39 = arith.constant 1.000000e+00 : f32
    %151 = vector.broadcast %cst_39 : f32 to vector<2x128xf32>
    %152 = arith.addf %151, %150 : vector<2x128xf32>
    %153 = arith.divf %151, %152 : vector<2x128xf32>
    %154 = vector.extract_strided_slice %129 {offsets = [0, 256], sizes = [2, 128], strides = [1, 1]} : vector<2x384xf32> to vector<2x128xf32>
    %155 = vector.extract_strided_slice %120 {offsets = [0, 256], sizes = [2, 128], strides = [1, 1]} : vector<2x384xf32> to vector<2x128xf32>
    %156 = arith.mulf %145, %155 : vector<2x128xf32>
    %157 = arith.addf %154, %156 : vector<2x128xf32>
    %158 = math.tanh %157 : vector<2x128xf32>
    %cst_40 = arith.constant 1.000000e+00 : f32
    %159 = vector.broadcast %cst_40 : f32 to vector<2x128xf32>
    %160 = arith.subf %159, %153 : vector<2x128xf32>
    %161 = arith.mulf %160, %158 : vector<2x128xf32>
    %162 = arith.mulf %153, %116 : vector<2x128xf32>
    %163 = arith.addf %161, %162 : vector<2x128xf32>
    %c0_41 = arith.constant 0 : index
    %c0_42 = arith.constant 0 : index
    %164 = vector.load %arg7[%c0_41, %c0_42] : memref<128x512xf32, #tpu.memory_space<vmem>>, vector<128x512xf32>
    %cst_43 = arith.constant dense<0.000000e+00> : vector<2x512xf32>
    %165 = tpu.matmul %163, %164, %cst_43 {dimension_numbers = #tpu.dot_dimension_numbers<[1], [0], [0], [1], [0, 0, 1, 1], [], []>} : vector<2x128xf32>, vector<128x512xf32>, vector<2x512xf32> -> vector<2x512xf32>
    %166 = arith.addf %165, %14 : vector<2x512xf32>
    %167 = vector.extract_strided_slice %166 {offsets = [0, 0], sizes = [2, 384], strides = [1, 1]} : vector<2x512xf32> to vector<2x384xf32>
    %168 = vector.extract_strided_slice %166 {offsets = [0, 384], sizes = [2, 2], strides = [1, 1]} : vector<2x512xf32> to vector<2x2xf32>
    %169 = vector.extract_strided_slice %168 {offsets = [0, 0], sizes = [2, 1], strides = [1, 1]} : vector<2x2xf32> to vector<2x1xf32>
    %170 = vector.broadcast %169 : vector<2x1xf32> to vector<2x384xf32>
    %171 = arith.mulf %170, %17 : vector<2x384xf32>
    %172 = vector.extract_strided_slice %168 {offsets = [0, 1], sizes = [2, 1], strides = [1, 1]} : vector<2x2xf32> to vector<2x1xf32>
    %173 = vector.broadcast %172 : vector<2x1xf32> to vector<2x384xf32>
    %174 = arith.mulf %173, %20 : vector<2x384xf32>
    %175 = arith.addf %171, %174 : vector<2x384xf32>
    %176 = arith.addf %175, %23 : vector<2x384xf32>
    %c1_i32_44 = arith.constant 1 : i32
    %177 = arith.addi %c2_i32, %c1_i32_44 : i32
    %c0_i32_45 = arith.constant 0 : i32
    %178 = arith.subi %177, %c0_i32_45 : i32
    %179 = vector.broadcast %178 : i32 to vector<2x2x128xi32>
    %180 = arith.cmpi eq, %36, %179 : vector<2x2x128xi32>
    %181 = vector.shape_cast %168 : vector<2x2xf32> to vector<2x2x1xf32>
    %182 = vector.shape_cast %181 : vector<2x2x1xf32> to vector<2x2x1xf32>
    %183 = vector.broadcast %182 : vector<2x2x1xf32> to vector<2x2x128xf32>
    %184 = arith.select %180, %183, %137 : vector<2x2x128xi1>, vector<2x2x128xf32>
    %c3_i32 = arith.constant 3 : i32
    %185 = vector.extract_strided_slice %176 {offsets = [0, 0], sizes = [2, 128], strides = [1, 1]} : vector<2x384xf32> to vector<2x128xf32>
    %186 = vector.extract_strided_slice %167 {offsets = [0, 0], sizes = [2, 128], strides = [1, 1]} : vector<2x384xf32> to vector<2x128xf32>
    %187 = arith.addf %185, %186 : vector<2x128xf32>
    %188 = arith.negf %187 : vector<2x128xf32>
    %189 = math.exp %188 : vector<2x128xf32>
    %cst_46 = arith.constant 1.000000e+00 : f32
    %190 = vector.broadcast %cst_46 : f32 to vector<2x128xf32>
    %191 = arith.addf %190, %189 : vector<2x128xf32>
    %192 = arith.divf %190, %191 : vector<2x128xf32>
    %193 = vector.extract_strided_slice %176 {offsets = [0, 128], sizes = [2, 128], strides = [1, 1]} : vector<2x384xf32> to vector<2x128xf32>
    %194 = vector.extract_strided_slice %167 {offsets = [0, 128], sizes = [2, 128], strides = [1, 1]} : vector<2x384xf32> to vector<2x128xf32>
    %195 = arith.addf %193, %194 : vector<2x128xf32>
    %196 = arith.negf %195 : vector<2x128xf32>
    %197 = math.exp %196 : vector<2x128xf32>
    %cst_47 = arith.constant 1.000000e+00 : f32
    %198 = vector.broadcast %cst_47 : f32 to vector<2x128xf32>
    %199 = arith.addf %198, %197 : vector<2x128xf32>
    %200 = arith.divf %198, %199 : vector<2x128xf32>
    %201 = vector.extract_strided_slice %176 {offsets = [0, 256], sizes = [2, 128], strides = [1, 1]} : vector<2x384xf32> to vector<2x128xf32>
    %202 = vector.extract_strided_slice %167 {offsets = [0, 256], sizes = [2, 128], strides = [1, 1]} : vector<2x384xf32> to vector<2x128xf32>
    %203 = arith.mulf %192, %202 : vector<2x128xf32>
    %204 = arith.addf %201, %203 : vector<2x128xf32>
    %205 = math.tanh %204 : vector<2x128xf32>
    %cst_48 = arith.constant 1.000000e+00 : f32
    %206 = vector.broadcast %cst_48 : f32 to vector<2x128xf32>
    %207 = arith.subf %206, %200 : vector<2x128xf32>
    %208 = arith.mulf %207, %205 : vector<2x128xf32>
    %209 = arith.mulf %200, %163 : vector<2x128xf32>
    %210 = arith.addf %208, %209 : vector<2x128xf32>
    %c0_49 = arith.constant 0 : index
    %c0_50 = arith.constant 0 : index
    %211 = vector.load %arg7[%c0_49, %c0_50] : memref<128x512xf32, #tpu.memory_space<vmem>>, vector<128x512xf32>
    %cst_51 = arith.constant dense<0.000000e+00> : vector<2x512xf32>
    %212 = tpu.matmul %210, %211, %cst_51 {dimension_numbers = #tpu.dot_dimension_numbers<[1], [0], [0], [1], [0, 0, 1, 1], [], []>} : vector<2x128xf32>, vector<128x512xf32>, vector<2x512xf32> -> vector<2x512xf32>
    %213 = arith.addf %212, %14 : vector<2x512xf32>
    %214 = vector.extract_strided_slice %213 {offsets = [0, 0], sizes = [2, 384], strides = [1, 1]} : vector<2x512xf32> to vector<2x384xf32>
    %215 = vector.extract_strided_slice %213 {offsets = [0, 384], sizes = [2, 2], strides = [1, 1]} : vector<2x512xf32> to vector<2x2xf32>
    %216 = vector.extract_strided_slice %215 {offsets = [0, 0], sizes = [2, 1], strides = [1, 1]} : vector<2x2xf32> to vector<2x1xf32>
    %217 = vector.broadcast %216 : vector<2x1xf32> to vector<2x384xf32>
    %218 = arith.mulf %217, %17 : vector<2x384xf32>
    %219 = vector.extract_strided_slice %215 {offsets = [0, 1], sizes = [2, 1], strides = [1, 1]} : vector<2x2xf32> to vector<2x1xf32>
    %220 = vector.broadcast %219 : vector<2x1xf32> to vector<2x384xf32>
    %221 = arith.mulf %220, %20 : vector<2x384xf32>
    %222 = arith.addf %218, %221 : vector<2x384xf32>
    %223 = arith.addf %222, %23 : vector<2x384xf32>
    %c1_i32_52 = arith.constant 1 : i32
    %224 = arith.addi %c3_i32, %c1_i32_52 : i32
    %c0_i32_53 = arith.constant 0 : i32
    %225 = arith.subi %224, %c0_i32_53 : i32
    %226 = vector.broadcast %225 : i32 to vector<2x2x128xi32>
    %227 = arith.cmpi eq, %36, %226 : vector<2x2x128xi32>
    %228 = vector.shape_cast %215 : vector<2x2xf32> to vector<2x2x1xf32>
    %229 = vector.shape_cast %228 : vector<2x2x1xf32> to vector<2x2x1xf32>
    %230 = vector.broadcast %229 : vector<2x2x1xf32> to vector<2x2x128xf32>
    %231 = arith.select %227, %230, %184 : vector<2x2x128xi1>, vector<2x2x128xf32>
    %c4_i32 = arith.constant 4 : i32
    %232 = vector.extract_strided_slice %223 {offsets = [0, 0], sizes = [2, 128], strides = [1, 1]} : vector<2x384xf32> to vector<2x128xf32>
    %233 = vector.extract_strided_slice %214 {offsets = [0, 0], sizes = [2, 128], strides = [1, 1]} : vector<2x384xf32> to vector<2x128xf32>
    %234 = arith.addf %232, %233 : vector<2x128xf32>
    %235 = arith.negf %234 : vector<2x128xf32>
    %236 = math.exp %235 : vector<2x128xf32>
    %cst_54 = arith.constant 1.000000e+00 : f32
    %237 = vector.broadcast %cst_54 : f32 to vector<2x128xf32>
    %238 = arith.addf %237, %236 : vector<2x128xf32>
    %239 = arith.divf %237, %238 : vector<2x128xf32>
    %240 = vector.extract_strided_slice %223 {offsets = [0, 128], sizes = [2, 128], strides = [1, 1]} : vector<2x384xf32> to vector<2x128xf32>
    %241 = vector.extract_strided_slice %214 {offsets = [0, 128], sizes = [2, 128], strides = [1, 1]} : vector<2x384xf32> to vector<2x128xf32>
    %242 = arith.addf %240, %241 : vector<2x128xf32>
    %243 = arith.negf %242 : vector<2x128xf32>
    %244 = math.exp %243 : vector<2x128xf32>
    %cst_55 = arith.constant 1.000000e+00 : f32
    %245 = vector.broadcast %cst_55 : f32 to vector<2x128xf32>
    %246 = arith.addf %245, %244 : vector<2x128xf32>
    %247 = arith.divf %245, %246 : vector<2x128xf32>
    %248 = vector.extract_strided_slice %223 {offsets = [0, 256], sizes = [2, 128], strides = [1, 1]} : vector<2x384xf32> to vector<2x128xf32>
    %249 = vector.extract_strided_slice %214 {offsets = [0, 256], sizes = [2, 128], strides = [1, 1]} : vector<2x384xf32> to vector<2x128xf32>
    %250 = arith.mulf %239, %249 : vector<2x128xf32>
    %251 = arith.addf %248, %250 : vector<2x128xf32>
    %252 = math.tanh %251 : vector<2x128xf32>
    %cst_56 = arith.constant 1.000000e+00 : f32
    %253 = vector.broadcast %cst_56 : f32 to vector<2x128xf32>
    %254 = arith.subf %253, %247 : vector<2x128xf32>
    %255 = arith.mulf %254, %252 : vector<2x128xf32>
    %256 = arith.mulf %247, %210 : vector<2x128xf32>
    %257 = arith.addf %255, %256 : vector<2x128xf32>
    %c0_57 = arith.constant 0 : index
    %c0_58 = arith.constant 0 : index
    %258 = vector.load %arg7[%c0_57, %c0_58] : memref<128x512xf32, #tpu.memory_space<vmem>>, vector<128x512xf32>
    %cst_59 = arith.constant dense<0.000000e+00> : vector<2x512xf32>
    %259 = tpu.matmul %257, %258, %cst_59 {dimension_numbers = #tpu.dot_dimension_numbers<[1], [0], [0], [1], [0, 0, 1, 1], [], []>} : vector<2x128xf32>, vector<128x512xf32>, vector<2x512xf32> -> vector<2x512xf32>
    %260 = arith.addf %259, %14 : vector<2x512xf32>
    %261 = vector.extract_strided_slice %260 {offsets = [0, 0], sizes = [2, 384], strides = [1, 1]} : vector<2x512xf32> to vector<2x384xf32>
    %262 = vector.extract_strided_slice %260 {offsets = [0, 384], sizes = [2, 2], strides = [1, 1]} : vector<2x512xf32> to vector<2x2xf32>
    %263 = vector.extract_strided_slice %262 {offsets = [0, 0], sizes = [2, 1], strides = [1, 1]} : vector<2x2xf32> to vector<2x1xf32>
    %264 = vector.broadcast %263 : vector<2x1xf32> to vector<2x384xf32>
    %265 = arith.mulf %264, %17 : vector<2x384xf32>
    %266 = vector.extract_strided_slice %262 {offsets = [0, 1], sizes = [2, 1], strides = [1, 1]} : vector<2x2xf32> to vector<2x1xf32>
    %267 = vector.broadcast %266 : vector<2x1xf32> to vector<2x384xf32>
    %268 = arith.mulf %267, %20 : vector<2x384xf32>
    %269 = arith.addf %265, %268 : vector<2x384xf32>
    %270 = arith.addf %269, %23 : vector<2x384xf32>
    %c1_i32_60 = arith.constant 1 : i32
    %271 = arith.addi %c4_i32, %c1_i32_60 : i32
    %c0_i32_61 = arith.constant 0 : i32
    %272 = arith.subi %271, %c0_i32_61 : i32
    %273 = vector.broadcast %272 : i32 to vector<2x2x128xi32>
    %274 = arith.cmpi eq, %36, %273 : vector<2x2x128xi32>
    %275 = vector.shape_cast %262 : vector<2x2xf32> to vector<2x2x1xf32>
    %276 = vector.shape_cast %275 : vector<2x2x1xf32> to vector<2x2x1xf32>
    %277 = vector.broadcast %276 : vector<2x2x1xf32> to vector<2x2x128xf32>
    %278 = arith.select %274, %277, %231 : vector<2x2x128xi1>, vector<2x2x128xf32>
    %c5_i32 = arith.constant 5 : i32
    %279 = vector.extract_strided_slice %270 {offsets = [0, 0], sizes = [2, 128], strides = [1, 1]} : vector<2x384xf32> to vector<2x128xf32>
    %280 = vector.extract_strided_slice %261 {offsets = [0, 0], sizes = [2, 128], strides = [1, 1]} : vector<2x384xf32> to vector<2x128xf32>
    %281 = arith.addf %279, %280 : vector<2x128xf32>
    %282 = arith.negf %281 : vector<2x128xf32>
    %283 = math.exp %282 : vector<2x128xf32>
    %cst_62 = arith.constant 1.000000e+00 : f32
    %284 = vector.broadcast %cst_62 : f32 to vector<2x128xf32>
    %285 = arith.addf %284, %283 : vector<2x128xf32>
    %286 = arith.divf %284, %285 : vector<2x128xf32>
    %287 = vector.extract_strided_slice %270 {offsets = [0, 128], sizes = [2, 128], strides = [1, 1]} : vector<2x384xf32> to vector<2x128xf32>
    %288 = vector.extract_strided_slice %261 {offsets = [0, 128], sizes = [2, 128], strides = [1, 1]} : vector<2x384xf32> to vector<2x128xf32>
    %289 = arith.addf %287, %288 : vector<2x128xf32>
    %290 = arith.negf %289 : vector<2x128xf32>
    %291 = math.exp %290 : vector<2x128xf32>
    %cst_63 = arith.constant 1.000000e+00 : f32
    %292 = vector.broadcast %cst_63 : f32 to vector<2x128xf32>
    %293 = arith.addf %292, %291 : vector<2x128xf32>
    %294 = arith.divf %292, %293 : vector<2x128xf32>
    %295 = vector.extract_strided_slice %270 {offsets = [0, 256], sizes = [2, 128], strides = [1, 1]} : vector<2x384xf32> to vector<2x128xf32>
    %296 = vector.extract_strided_slice %261 {offsets = [0, 256], sizes = [2, 128], strides = [1, 1]} : vector<2x384xf32> to vector<2x128xf32>
    %297 = arith.mulf %286, %296 : vector<2x128xf32>
    %298 = arith.addf %295, %297 : vector<2x128xf32>
    %299 = math.tanh %298 : vector<2x128xf32>
    %cst_64 = arith.constant 1.000000e+00 : f32
    %300 = vector.broadcast %cst_64 : f32 to vector<2x128xf32>
    %301 = arith.subf %300, %294 : vector<2x128xf32>
    %302 = arith.mulf %301, %299 : vector<2x128xf32>
    %303 = arith.mulf %294, %257 : vector<2x128xf32>
    %304 = arith.addf %302, %303 : vector<2x128xf32>
    %c0_65 = arith.constant 0 : index
    %c0_66 = arith.constant 0 : index
    %305 = vector.load %arg7[%c0_65, %c0_66] : memref<128x512xf32, #tpu.memory_space<vmem>>, vector<128x512xf32>
    %cst_67 = arith.constant dense<0.000000e+00> : vector<2x512xf32>
    %306 = tpu.matmul %304, %305, %cst_67 {dimension_numbers = #tpu.dot_dimension_numbers<[1], [0], [0], [1], [0, 0, 1, 1], [], []>} : vector<2x128xf32>, vector<128x512xf32>, vector<2x512xf32> -> vector<2x512xf32>
    %307 = arith.addf %306, %14 : vector<2x512xf32>
    %308 = vector.extract_strided_slice %307 {offsets = [0, 0], sizes = [2, 384], strides = [1, 1]} : vector<2x512xf32> to vector<2x384xf32>
    %309 = vector.extract_strided_slice %307 {offsets = [0, 384], sizes = [2, 2], strides = [1, 1]} : vector<2x512xf32> to vector<2x2xf32>
    %310 = vector.extract_strided_slice %309 {offsets = [0, 0], sizes = [2, 1], strides = [1, 1]} : vector<2x2xf32> to vector<2x1xf32>
    %311 = vector.broadcast %310 : vector<2x1xf32> to vector<2x384xf32>
    %312 = arith.mulf %311, %17 : vector<2x384xf32>
    %313 = vector.extract_strided_slice %309 {offsets = [0, 1], sizes = [2, 1], strides = [1, 1]} : vector<2x2xf32> to vector<2x1xf32>
    %314 = vector.broadcast %313 : vector<2x1xf32> to vector<2x384xf32>
    %315 = arith.mulf %314, %20 : vector<2x384xf32>
    %316 = arith.addf %312, %315 : vector<2x384xf32>
    %317 = arith.addf %316, %23 : vector<2x384xf32>
    %c1_i32_68 = arith.constant 1 : i32
    %318 = arith.addi %c5_i32, %c1_i32_68 : i32
    %c0_i32_69 = arith.constant 0 : i32
    %319 = arith.subi %318, %c0_i32_69 : i32
    %320 = vector.broadcast %319 : i32 to vector<2x2x128xi32>
    %321 = arith.cmpi eq, %36, %320 : vector<2x2x128xi32>
    %322 = vector.shape_cast %309 : vector<2x2xf32> to vector<2x2x1xf32>
    %323 = vector.shape_cast %322 : vector<2x2x1xf32> to vector<2x2x1xf32>
    %324 = vector.broadcast %323 : vector<2x2x1xf32> to vector<2x2x128xf32>
    %325 = arith.select %321, %324, %278 : vector<2x2x128xi1>, vector<2x2x128xf32>
    %c6_i32 = arith.constant 6 : i32
    %326 = vector.extract_strided_slice %317 {offsets = [0, 0], sizes = [2, 128], strides = [1, 1]} : vector<2x384xf32> to vector<2x128xf32>
    %327 = vector.extract_strided_slice %308 {offsets = [0, 0], sizes = [2, 128], strides = [1, 1]} : vector<2x384xf32> to vector<2x128xf32>
    %328 = arith.addf %326, %327 : vector<2x128xf32>
    %329 = arith.negf %328 : vector<2x128xf32>
    %330 = math.exp %329 : vector<2x128xf32>
    %cst_70 = arith.constant 1.000000e+00 : f32
    %331 = vector.broadcast %cst_70 : f32 to vector<2x128xf32>
    %332 = arith.addf %331, %330 : vector<2x128xf32>
    %333 = arith.divf %331, %332 : vector<2x128xf32>
    %334 = vector.extract_strided_slice %317 {offsets = [0, 128], sizes = [2, 128], strides = [1, 1]} : vector<2x384xf32> to vector<2x128xf32>
    %335 = vector.extract_strided_slice %308 {offsets = [0, 128], sizes = [2, 128], strides = [1, 1]} : vector<2x384xf32> to vector<2x128xf32>
    %336 = arith.addf %334, %335 : vector<2x128xf32>
    %337 = arith.negf %336 : vector<2x128xf32>
    %338 = math.exp %337 : vector<2x128xf32>
    %cst_71 = arith.constant 1.000000e+00 : f32
    %339 = vector.broadcast %cst_71 : f32 to vector<2x128xf32>
    %340 = arith.addf %339, %338 : vector<2x128xf32>
    %341 = arith.divf %339, %340 : vector<2x128xf32>
    %342 = vector.extract_strided_slice %317 {offsets = [0, 256], sizes = [2, 128], strides = [1, 1]} : vector<2x384xf32> to vector<2x128xf32>
    %343 = vector.extract_strided_slice %308 {offsets = [0, 256], sizes = [2, 128], strides = [1, 1]} : vector<2x384xf32> to vector<2x128xf32>
    %344 = arith.mulf %333, %343 : vector<2x128xf32>
    %345 = arith.addf %342, %344 : vector<2x128xf32>
    %346 = math.tanh %345 : vector<2x128xf32>
    %cst_72 = arith.constant 1.000000e+00 : f32
    %347 = vector.broadcast %cst_72 : f32 to vector<2x128xf32>
    %348 = arith.subf %347, %341 : vector<2x128xf32>
    %349 = arith.mulf %348, %346 : vector<2x128xf32>
    %350 = arith.mulf %341, %304 : vector<2x128xf32>
    %351 = arith.addf %349, %350 : vector<2x128xf32>
    %c0_73 = arith.constant 0 : index
    %c0_74 = arith.constant 0 : index
    %352 = vector.load %arg7[%c0_73, %c0_74] : memref<128x512xf32, #tpu.memory_space<vmem>>, vector<128x512xf32>
    %cst_75 = arith.constant dense<0.000000e+00> : vector<2x512xf32>
    %353 = tpu.matmul %351, %352, %cst_75 {dimension_numbers = #tpu.dot_dimension_numbers<[1], [0], [0], [1], [0, 0, 1, 1], [], []>} : vector<2x128xf32>, vector<128x512xf32>, vector<2x512xf32> -> vector<2x512xf32>
    %354 = arith.addf %353, %14 : vector<2x512xf32>
    %355 = vector.extract_strided_slice %354 {offsets = [0, 0], sizes = [2, 384], strides = [1, 1]} : vector<2x512xf32> to vector<2x384xf32>
    %356 = vector.extract_strided_slice %354 {offsets = [0, 384], sizes = [2, 2], strides = [1, 1]} : vector<2x512xf32> to vector<2x2xf32>
    %357 = vector.extract_strided_slice %356 {offsets = [0, 0], sizes = [2, 1], strides = [1, 1]} : vector<2x2xf32> to vector<2x1xf32>
    %358 = vector.broadcast %357 : vector<2x1xf32> to vector<2x384xf32>
    %359 = arith.mulf %358, %17 : vector<2x384xf32>
    %360 = vector.extract_strided_slice %356 {offsets = [0, 1], sizes = [2, 1], strides = [1, 1]} : vector<2x2xf32> to vector<2x1xf32>
    %361 = vector.broadcast %360 : vector<2x1xf32> to vector<2x384xf32>
    %362 = arith.mulf %361, %20 : vector<2x384xf32>
    %363 = arith.addf %359, %362 : vector<2x384xf32>
    %364 = arith.addf %363, %23 : vector<2x384xf32>
    %c1_i32_76 = arith.constant 1 : i32
    %365 = arith.addi %c6_i32, %c1_i32_76 : i32
    %c0_i32_77 = arith.constant 0 : i32
    %366 = arith.subi %365, %c0_i32_77 : i32
    %367 = vector.broadcast %366 : i32 to vector<2x2x128xi32>
    %368 = arith.cmpi eq, %36, %367 : vector<2x2x128xi32>
    %369 = vector.shape_cast %356 : vector<2x2xf32> to vector<2x2x1xf32>
    %370 = vector.shape_cast %369 : vector<2x2x1xf32> to vector<2x2x1xf32>
    %371 = vector.broadcast %370 : vector<2x2x1xf32> to vector<2x2x128xf32>
    %372 = arith.select %368, %371, %325 : vector<2x2x128xi1>, vector<2x2x128xf32>
    %c7_i32 = arith.constant 7 : i32
    %c0_78 = arith.constant 0 : index
    %c0_79 = arith.constant 0 : index
    %c0_80 = arith.constant 0 : index
    %373 = vector.load %arg9[%c0_78, %c0_79, %c0_80] : memref<2x2x128xf32, #tpu.memory_space<vmem>>, vector<2x2x128xf32>
    tpu.vector_store %arg9[%c0_78, %c0_79, %c0_80], %372 {strides = array<i32>} : memref<2x2x128xf32, #tpu.memory_space<vmem>>, vector<2x2x128xf32>,
    return
  }
}

</mosaic_0001>

<bundles_post_ra>
// kernel: tpu_custom_call.1
= control target key start
LH: loop header
LB: loop body
LE: loop exit
PB: predicated region body
PF: predicated region fallthrough
CT: control target
= control target key end

     0   :  { %14 = vsyncpa [#allocation3], 0  ;;  %s3291_s0 = inlined_call_operand.hbm [shape: f32[2,4], index: 0, kind: input, shape index: {}]   ;;  %s3292_s1 = inlined_call_operand.vmem [shape: f32[4,128], index: 1, kind: input, shape index: {}]   ;;  %s3293_s2 = inlined_call_operand.vmem [shape: f32[1,128], index: 2, kind: input, shape index: {}]   ;;  %s3294_s3 = inlined_call_operand.vmem [shape: f32[4,2], index: 3, kind: input, shape index: {}]   ;;  %s3295_s4 = inlined_call_operand.hbm [shape: f32[1,2], index: 4, kind: input, shape index: {}]   ;;  %s3296_s5 = inlined_call_operand.vmem [shape: f32[2,384], index: 5, kind: input, shape index: {}]   ;;  %s3297_s6 = inlined_call_operand.hbm [shape: f32[1,384], index: 6, kind: input, shape index: {}]   ;;  %s3298_s7 = inlined_call_operand.hbm [shape: f32[128,512], index: 7, kind: input, shape index: {}]   ;;  %s3299_s8 = inlined_call_operand.vmem [shape: f32[1,512], index: 8, kind: input, shape index: {}]   ;;  %s3300_s9 = inlined_call_operand.hbm [shape: f32[2,2,128], index: 9, kind: output, shape index: {}]  }
   0x1   :  { %15 = vsyncpa [#allocation6], 0 }
   0x2   :  { %16 = vsyncpa [#allocation9], 0 }
   0x3   :  { %17 = vsyncpa [#allocation4], 0  ;;  %s2201_s30 = smov [#allocation5]   ;;  %s2202_s11 = smov [#allocation2]  }
   0x4   :  { %s40_s10 = sshll.u32 %s2201_s30, 4  ;;  %s24_s12 = sshll.u32 %s2202_s11, 4  ;;  %s41_s10 = int_to_ptr.vmem [resolvable:$true] %s40_s10  ;;  %s25_s12 = int_to_ptr.vmem [resolvable:$true] %s24_s12 }
   0x5   :  { %s2101_s13 = scalar_lea.vmem %s41_s10, 16  ;;  %s2105_s14 = scalar_lea.vmem %s41_s10, 32 }
   0x6   :  { %p2102_p0 = scmp.ne.s32.totalorder %s41_s10, %s2101_s13  ;;  %p2106_p1 = scmp.lt.s32.totalorder %s41_s10, %s41_s10 }
   0x7   :  { %p2107_p2 = scmp.lt.s32.totalorder %s2105_s14, %s2101_s13 }
   0x9   :  { %p2108_p3 = por %p2107_p2, %p2106_p1 }
   0xb   :  { %p2109_p4 = pnand %p2108_p3, %p2102_p0 }
   0xd   :  { %2112 = shalt.err (!%p2109_p4)
}
   0xe   :  { %43 = dma.hbm_to_vmem [thread:$0]  %s3295_s4, 16, %s41_s10, [#allocation6]  }
   0xf   :  { %s2121_s17 = scalar_lea.vmem %s25_s12, 32  ;;  %p2126_p6 = scmp.lt.s32.totalorder %s25_s12, %s25_s12 }
  0x10   :  { %p2122_p5 = scmp.ne.s32.totalorder %s25_s12, %s2121_s17  ;;  %p2127_p7 = scmp.lt.s32.totalorder %s2121_s17, %s2121_s17 }
  0x12   :  { %p2128_p8 = por %p2127_p7, %p2126_p6 }
  0x14   :  { %p2129_p9 = pnand %p2128_p8, %p2122_p5 }
  0x16   :  { %2132 = shalt.err (!%p2129_p9)
}
  0x17   :  { %27 = dma.hbm_to_vmem [thread:$0]  %s3291_s0, 32, %s25_s12, [#allocation3]  }
  0x18   :  { %s2203_s20 = smov [#allocation7]   ;;  %s2204_s22 = smov [#allocation8]  }
  0x19   :  { %s52_s21 = sshll.u32 %s2203_s20, 4  ;;  %s61_s23 = sshll.u32 %s2204_s22, 4  ;;  %s53_s21 = int_to_ptr.vmem [resolvable:$true] %s52_s21  ;;  %s62_s23 = int_to_ptr.vmem [resolvable:$true] %s61_s23 }
  0x1a   :  { %s2141_s24 = scalar_lea.vmem %s53_s21, 48  ;;  %s2145_s4 = scalar_lea.vmem %s53_s21, 64 }
  0x1b   :  { %p2142_p10 = scmp.ne.s32.totalorder %s53_s21, %s2141_s24  ;;  %p2146_p11 = scmp.lt.s32.totalorder %s53_s21, %s53_s21 }
  0x1c   :  { %p2147_p12 = scmp.lt.s32.totalorder %s2145_s4, %s2141_s24 }
  0x1e   :  { %p2148_p13 = por %p2147_p12, %p2146_p11 }
  0x20   :  { %p2149_p0 = pnand %p2148_p13, %p2142_p10 }
  0x22   :  { %2152 = shalt.err (!%p2149_p0)
}
  0x23   :  { %55 = dma.hbm_to_vmem [thread:$0]  %s3297_s6, 48, %s53_s21, [#allocation6]  }
  0x24   :  { %s2161_s27 = scalar_lea.vmem %s62_s23, 8192  ;;  %p2166_p2 = scmp.lt.s32.totalorder %s62_s23, %s62_s23 }
  0x25   :  { %p2162_p1 = scmp.ne.s32.totalorder %s62_s23, %s2161_s27  ;;  %p2167_p3 = scmp.lt.s32.totalorder %s2161_s27, %s2161_s27 }
  0x27   :  { %p2168_p4 = por %p2167_p3, %p2166_p2 }
  0x29   :  { %p2169_p5 = pnand %p2168_p4, %p2162_p1 }
  0x2b   :  { %2172 = shalt.err (!%p2169_p5)
}
  0x2c   :  { %s2205_s0 = smov 512   ;;  %s2206_s28 = smov 32  }
  0x2d   :  { %67 = dma.hbm_to_vmem [thread:$0]  %s3298_s7, 8192, %s62_s23, [#allocation9], %s2205_s0, %s2205_s0, %s2206_s28  }
  0x2e   :  { %2193 = dma.done.wait [#allocation3], 32  }
  0x2f   :  { %2194 = vsyncadd [#allocation3], 4294967264 }
  0x30   :  { %2195 = dma.done.wait [#allocation6], 64  }
  0x31   :  { %2196 = vsyncadd [#allocation6], 4294967232 }
  0x32   :  { %2197 = dma.done.wait [#allocation9], 8192  }
  0x33   :  { %2198 = vsyncadd [#allocation9], 4294959104  ;;  %v3301_v0 = vmov 0.0   ;;  %vm2208_vm0 = vmmov 0   ;;  %vm95_vm1 = vcmask 1043456   ;;  %vm91_vm2 = vcmask 31744  }
  0x34   :  { %1930 = vmatprep.subr.mxu1 %v3301_v0  ;;  %1932 = vmatprep.mubr.msk.f32.mxu1 %vm2208_vm0, %v3301_v0  ;;  %v83_v1 = vld [vmem:[%s3292_s1] sm:$0xf]  ;;  %v2285_v4 = vld [vmem:[#allocation8 + $0x1e8] sm:$0xff]  ;;  %v2291_v6 = vld [vmem:[#allocation8 + $0x1e0] sm:$0xff] }
  0x35   :  { %453 = vmatprep.mubr.f32.mxu0 %v3301_v0  ;;  %v82_v2 = vld [vmem:[#allocation2] sm:$0x3]  ;;  %1931 = vmatpush3.msk.msra.mxu1 %vm95_vm1, %v83_v1  ;;  %3451 = vst [vmem:[#allocation15_spill] sm:$0xff] %v2285_v4  ;;  %v2294_v7 = vld [vmem:[#allocation8 + $0x1c8] sm:$0xff]  ;;  %v2298_v8 = vld [vmem:[#allocation8 + $0x1f0] sm:$0xff] }
  0x36   :  { %v170_v3 = vld [vmem:[%s3294_s3] sm:$0xf]  ;;  %1933 = vmatmul.mubr.msk.f32.vlgmr.msra.gmra.mxu1 %vm91_vm2, %v82_v2  ;;  %1935 = vmatprep.subr.mxu1 %v3301_v0  ;;  %v2300_v9 = vld [vmem:[#allocation8 + $0x1c0] sm:$0xff]  ;;  %v2305_v11 = vld [vmem:[#allocation8 + $0x1a8] sm:$0xff] }
  0x37   :  { %v2287_v5 = vld [vmem:[#allocation8 + $0x1f8] sm:$0xff]  ;;  %1936 = vmatpush3.msk.msra.mxu1 %vm95_vm1, %v170_v3  ;;  %1937 = vmatprep.mubr.msk.f32.mxu1 %vm2208_vm0, %v3301_v0  ;;  %v2309_v12 = vld [vmem:[#allocation8 + $0x1d0] sm:$0xff]  ;;  %v2311_v13 = vld [vmem:[#allocation8 + $0x1a0] sm:$0xff] }
  0x38   :  { %3452 = vst [vmem:[#allocation16_spill] sm:$0xff] %v2287_v5  ;;  %389 = vmatprep.subr.mxu0 %v2285_v4  ;;  %460 = vmatprep.subr.mxu1 %v2287_v5  ;;  %v2303_v10 = vld [vmem:[#allocation8 + $0x1d8] sm:$0xff]  ;;  %v2317_v15 = vld [vmem:[#allocation8 + $0x188] sm:$0xff]  ;;  %v2321_v16 = vld [vmem:[#allocation8 + $0x1b0] sm:$0xff] }
  0x39   :  { %390 = vmatpush1.msra.mxu0 %v2291_v6  ;;  %v2315_v14 = vld [vmem:[#allocation8 + $0x1b8] sm:$0xff]  ;;  %v2323_v17 = vld [vmem:[#allocation8 + $0x180] sm:$0xff]  ;;  %v2329_v19 = vld [vmem:[#allocation8 + $0x168] sm:$0xff] }
  0x3a   :  { %1938 = vmatmul.mubr.msk.f32.vlgmr.msra.gmra.mxu1 %vm91_vm2, %v82_v2  ;;  %391 = vmatprep.subr.mxu0 %v2294_v7  ;;  %v2327_v18 = vld [vmem:[#allocation8 + $0x198] sm:$0xff]  ;;  %v2333_v20 = vld [vmem:[#allocation8 + $0x190] sm:$0xff]  ;;  %v2335_v21 = vld [vmem:[#allocation8 + $0x160] sm:$0xff] }
  0x3b   :  { %461 = vmatpush1.msra.mxu1 %v2298_v8  ;;  %392 = vmatpush1.msra.mxu0 %v2300_v9  ;;  %v2339_v22 = vld [vmem:[#allocation8 + $0x178] sm:$0xff]  ;;  %v2341_v23 = vld [vmem:[#allocation8 + $0x148] sm:$0xff]  ;;  %v2345_v24 = vld [vmem:[#allocation8 + $0x170] sm:$0xff] }
  0x3c   :  { %462 = vmatprep.subr.mxu1 %v2303_v10  ;;  %393 = vmatprep.subr.mxu0 %v2305_v11  ;;  %v2347_v25 = vld [vmem:[#allocation8 + $0x140] sm:$0xff]  ;;  %v2351_v26 = vld [vmem:[#allocation8 + $0x158] sm:$0xff]  ;;  %v2353_v27 = vld [vmem:[#allocation8 + $0x128] sm:$0xff] }
  0x3d   :  { %463 = vmatpush1.msra.mxu1 %v2309_v12  ;;  %394 = vmatpush1.msra.mxu0 %v2311_v13  ;;  %v2357_v28 = vld [vmem:[#allocation8 + $0x150] sm:$0xff]  ;;  %v2359_v29 = vld [vmem:[#allocation8 + $0x120] sm:$0xff]  ;;  %v2363_v30 = vld [vmem:[#allocation8 + $0x138] sm:$0xff] }
  0x3e   :  { %464 = vmatprep.subr.mxu1 %v2315_v14  ;;  %395 = vmatprep.subr.mxu0 %v2317_v15  ;;  %v2365_v31 = vld [vmem:[#allocation8 + $0x108] sm:$0xff]  ;;  %v2369_v32 = vld [vmem:[#allocation8 + $0x130] sm:$0xff]  ;;  %v2373_v33 = vld [vmem:[#allocation8 + $0x118] sm:$0xff] }
  0x3f   :  { %465 = vmatpush1.msra.mxu1 %v2321_v16  ;;  %396 = vmatpush1.msra.mxu0 %v2323_v17  ;;  %v2380_v34 = vld [vmem:[#allocation8 + $0x100] sm:$0xff]  ;;  %v2382_v35 = vld [vmem:[#allocation8 + $0x110] sm:$0xff]  ;;  %v2386_v36 = vld [vmem:[#allocation8 + $0xe8] sm:$0xff] }
  0x40   :  { %466 = vmatprep.subr.mxu1 %v2327_v18  ;;  %397 = vmatprep.subr.mxu0 %v2329_v19  ;;  %v2388_v37 = vld [vmem:[#allocation8 + $0xf8] sm:$0xff]  ;;  %v2392_v38 = vld [vmem:[#allocation8 + $0xe0] sm:$0xff]  ;;  %v2394_v39 = vld [vmem:[#allocation8 + $0xf0] sm:$0xff] }
  0x41   :  { %467 = vmatpush1.msra.mxu1 %v2333_v20  ;;  %398 = vmatpush1.msra.mxu0 %v2335_v21  ;;  %3453 = vst [vmem:[#allocation17_spill] sm:$0xff] %v2394_v39  ;;  %v2398_v40 = vld [vmem:[#allocation8 + $0xc8] sm:$0xff]  ;;  %v2400_v41 = vld [vmem:[#allocation8 + $0xd8] sm:$0xff]  ;;  %v2404_v42 = vld [vmem:[#allocation8 + $0xc0] sm:$0xff] }
  0x42   :  { %468 = vmatprep.subr.mxu1 %v2339_v22  ;;  %399 = vmatprep.subr.mxu0 %v2341_v23  ;;  %3454 = vst [vmem:[#allocation18_spill] sm:$0xff] %v2398_v40  ;;  %3455 = vst [vmem:[#allocation19_spill] sm:$0xff] %v2400_v41  ;;  %v2406_v43 = vld [vmem:[#allocation8 + $0xd0] sm:$0xff]  ;;  %v2408_v44 = vld [vmem:[#allocation8 + $0xa8] sm:$0xff] }
  0x43   :  { %469 = vmatpush1.msra.mxu1 %v2345_v24  ;;  %400 = vmatpush1.msra.mxu0 %v2347_v25  ;;  %3456 = vst [vmem:[#allocation20_spill] sm:$0xff] %v2404_v42  ;;  %3457 = vst [vmem:[#allocation21_spill] sm:$0xff] %v2406_v43  ;;  %v2412_v45 = vld [vmem:[#allocation8 + $0xb8] sm:$0xff]  ;;  %v2414_v46 = vld [vmem:[#allocation8 + $0xa0] sm:$0xff] }
  0x44   :  { %470 = vmatprep.subr.mxu1 %v2351_v26  ;;  %401 = vmatprep.subr.mxu0 %v2353_v27  ;;  %3458 = vst [vmem:[#allocation22_spill] sm:$0xff] %v2408_v44  ;;  %3459 = vst [vmem:[#allocation23_spill] sm:$0xff] %v2412_v45  ;;  %v2416_v47 = vld [vmem:[#allocation8 + $0xb0] sm:$0xff]  ;;  %v2420_v48 = vld [vmem:[#allocation8 + $0x88] sm:$0xff] }
  0x45   :  { %471 = vmatpush1.msra.mxu1 %v2357_v28  ;;  %402 = vmatpush1.msra.mxu0 %v2359_v29  ;;  %3460 = vst [vmem:[#allocation24_spill] sm:$0xff] %v2414_v46  ;;  %3461 = vst [vmem:[#allocation25_spill] sm:$0xff] %v2416_v47  ;;  %v2422_v49 = vld [vmem:[#allocation8 + $0x98] sm:$0xff]  ;;  %v2424_v50 = vld [vmem:[#allocation8 + $0x80] sm:$0xff] }
  0x46   :  { %472 = vmatprep.subr.mxu1 %v2363_v30  ;;  %403 = vmatprep.subr.mxu0 %v2365_v31  ;;  %3462 = vst [vmem:[#allocation26_spill] sm:$0xff] %v2420_v48  ;;  %3463 = vst [vmem:[#allocation27_spill] sm:$0xff] %v2422_v49  ;;  %v2428_v51 = vld [vmem:[#allocation8 + $0x90] sm:$0xff]  ;;  %v2430_v52 = vld [vmem:[#allocation8 + $0x68] sm:$0xff] }
  0x47   :  { %473 = vmatpush1.msra.mxu1 %v2369_v32  ;;  %524 = vmatprep.mubr.f32.mxu1 %v3301_v0  ;;  %3464 = vst [vmem:[#allocation28_spill] sm:$0xff] %v2424_v50  ;;  %3465 = vst [vmem:[#allocation29_spill] sm:$0xff] %v2428_v51  ;;  %v2432_v53 = vld [vmem:[#allocation8 + $0x78] sm:$0xff]  ;;  %v2436_v54 = vld [vmem:[#allocation8 + $0x60] sm:$0xff] }
  0x48   :  { %474 = vmatprep.subr.mxu1 %v2373_v33  ;;  %404 = vmatpush1.msra.mxu0 %v2380_v34  ;;  %3466 = vst [vmem:[#allocation30_spill] sm:$0xff] %v2430_v52  ;;  %3467 = vst [vmem:[#allocation31_spill] sm:$0xff] %v2432_v53  ;;  %v2438_v55 = vld [vmem:[#allocation8 + $0x70] sm:$0xff]  ;;  %v2442_v56 = vld [vmem:[#allocation8 + $0x48] sm:$0xff] }
  0x49   :  { %475 = vmatpush1.msra.mxu1 %v2382_v35  ;;  %405 = vmatprep.subr.mxu0 %v2386_v36  ;;  %3468 = vst [vmem:[#allocation32_spill] sm:$0xff] %v2436_v54  ;;  %3469 = vst [vmem:[#allocation33_spill] sm:$0xff] %v2438_v55  ;;  %v2444_v57 = vld [vmem:[#allocation8 + $0x58] sm:$0xff]  ;;  %v2448_v58 = vld [vmem:[#allocation8 + $0x40] sm:$0xff] }
  0x4a   :  { %476 = vmatprep.subr.mxu1 %v2388_v37  ;;  %406 = vmatpush1.msra.mxu0 %v2392_v38  ;;  %3470 = vst [vmem:[#allocation34_spill] sm:$0xff] %v2442_v56  ;;  %3471 = vst [vmem:[#allocation35_spill] sm:$0xff] %v2444_v57  ;;  %v2450_v59 = vld [vmem:[#allocation8 + $0x50] sm:$0xff]  ;;  %v2454_v60 = vld [vmem:[#allocation8 + $0x28] sm:$0xff] }
  0x4b   :  { %477 = vmatpush1.msra.mxu1 %v2394_v39  ;;  %407 = vmatprep.subr.mxu0 %v2398_v40  ;;  %3472 = vst [vmem:[#allocation36_spill] sm:$0xff] %v2448_v58  ;;  %3473 = vst [vmem:[#allocation37_spill] sm:$0xff] %v2450_v59  ;;  %v2456_v61 = vld [vmem:[#allocation8 + $0x38] sm:$0xff]  ;;  %v2460_v62 = vld [vmem:[#allocation8 + $0x20] sm:$0xff] }
  0x4c   :  { %478 = vmatprep.subr.mxu1 %v2400_v41  ;;  %408 = vmatpush1.msra.mxu0 %v2404_v42  ;;  %3474 = vst [vmem:[#allocation38_spill] sm:$0xff] %v2454_v60  ;;  %3475 = vst [vmem:[#allocation39_spill] sm:$0xff] %v2456_v61  ;;  %v2462_v63 = vld [vmem:[#allocation8 + $0x30] sm:$0xff]  ;;  %v2466_v1 = vld [vmem:[#allocation8 + $0x8] sm:$0xff] }
  0x4d   :  { %479 = vmatpush1.msra.mxu1 %v2406_v43  ;;  %409 = vmatprep.subr.mxu0 %v2408_v44  ;;  %3476 = vst [vmem:[#allocation40_spill] sm:$0xff] %v2460_v62  ;;  %3477 = vst [vmem:[#allocation41_spill] sm:$0xff] %v2462_v63  ;;  %v2468_v2 = vld [vmem:[#allocation8 + $0x18] sm:$0xff]  ;;  %v2472_v3 = vld [vmem:[#allocation8] sm:$0xff] }
  0x4e   :  { %480 = vmatprep.subr.mxu1 %v2412_v45  ;;  %410 = vmatpush1.msra.mxu0 %v2414_v46  ;;  %3478 = vst [vmem:[#allocation42_spill] sm:$0xff] %v2466_v1  ;;  %3479 = vst [vmem:[#allocation43_spill] sm:$0xff] %v2468_v2  ;;  %v2474_v0 = vld [vmem:[#allocation8 + $0x10] sm:$0xff] }
  0x4f   :  { %481 = vmatpush1.msra.mxu1 %v2416_v47  ;;  %411 = vmatprep.subr.mxu0 %v2420_v48  ;;  %3480 = vst [vmem:[#allocation44_spill] sm:$0xff] %v2472_v3  ;;  %3481 = vst [vmem:[#allocation45_spill] sm:$0xff] %v2474_v0 }
  0x50   :  { %482 = vmatprep.subr.mxu1 %v2422_v49  ;;  %412 = vmatpush1.msra.mxu0 %v2424_v50 }
  0x51   :  { %483 = vmatpush1.msra.mxu1 %v2428_v51  ;;  %413 = vmatprep.subr.mxu0 %v2430_v52 }
  0x52   :  { %484 = vmatprep.subr.mxu1 %v2432_v53  ;;  %414 = vmatpush1.msra.mxu0 %v2436_v54 }
  0x53   :  { %485 = vmatpush1.msra.mxu1 %v2438_v55  ;;  %415 = vmatprep.subr.mxu0 %v2442_v56 }
  0x54   :  { %486 = vmatprep.subr.mxu1 %v2444_v57  ;;  %416 = vmatpush1.msra.mxu0 %v2448_v58 }
  0x55   :  { %487 = vmatpush1.msra.mxu1 %v2450_v59  ;;  %417 = vmatprep.subr.mxu0 %v2454_v60  ;;  %v1908_v60 = vld [vmem:[#allocation5] ss:$0 sm:$0xff] }
  0x56   :  { %488 = vmatprep.subr.mxu1 %v2456_v61  ;;  %418 = vmatpush1.msra.mxu0 %v2460_v62  ;;  %v3323_v61 = vmov 0  }
  0x57   :  { %489 = vmatpush1.msra.mxu1 %v2462_v63  ;;  %419 = vmatprep.subr.mxu0 %v2466_v1  ;;  %v1905_v63 = vld [vmem:[%s3293_s2] ss:$0 sm:$0xff] }
  0x58   :  { %490 = vmatprep.subr.mxu1 %v2468_v2  ;;  %420 = vmatpush1.msra.mxu0 %v2472_v3 }
  0x59   :  { %491 = vmatpush1.msra.mxu1 %v2474_v0  ;;  %591 = vmatprep.subr.mxu0 %v2285_v4 }
  0x5a   :  { %662 = vmatprep.subr.mxu1 %v2287_v5  ;;  %1952 = vset.pattern.permute.xlu0 %v3323_v61  ;;  %v3324_v5 = vmov 1  }
  0x5b   :  { %1954 = vset.pattern.permute.xlu1 %v3323_v61 }
  0xf6   :  { %v165_v1 = vpop.f32.mrf.mxu1 }
  0xf7   :  { %v166_v62 = vadd.f32 %v1905_v63, %v165_v1  ;;  %v3486_v63 = vld [vmem:[#allocation41_spill] sm:$0xff]  ;;  %v3487_v1 = vld [vmem:[#allocation42_spill] sm:$0xff] }
  0xf8   :  { %v1934_v2 = vpop.f32.mrf.mxu1 }
  0xf9   :  { %1957 = vtanh.f32 %v166_v62  ;;  %v3485_v62 = vld [vmem:[#allocation40_spill] sm:$0xff]  ;;  %v3488_v2 = vld [vmem:[#allocation43_spill] sm:$0xff] }
  0xfa   :  { %v247_v3 = vpop.f32.mrf.mxu1 }
  0xfb   :  { %v2489_v0 = vadd.f32 %v1908_v60, %v247_v3  ;;  %v3484_v60 = vld [vmem:[#allocation39_spill] sm:$0xff]  ;;  %v3489_v3 = vld [vmem:[#allocation44_spill] sm:$0xff] }
  0xfc   :  { %v1939_v4 = vpop.f32.mrf.mxu1 }
  0xfd   :  { %3482 = vst [vmem:[#allocation46_spill] sm:$0xff] %v2489_v0  ;;  %532 = vperm.xlu0 %1952, %v2489_v0   ;;  %v3483_v4 = vld [vmem:[#allocation38_spill] sm:$0xff] }
 0x101   :  { %1953 = vset.pattern.permute.xlu0 %v3324_v5  ;;  %v3490_v5 = vmov 0.0  }
 0x102   :  { %539 = vperm.xlu0 %1953, %v2489_v0   ;;  %v3491_v0 = vld [vmem:[#allocation45_spill] sm:$0xff] }
 0x106   :  { %v2494_v61 = vpop.eup %1957 }
 0x107   :  { %454 = vmatmul.mubr.f32.vlgmr.msra.gmra.mxu0 %v2494_v61  ;;  %525 = vmatmul.mubr.f32.vlgmr.msra.gmra.mxu1 %v2494_v61 }
 0x108   :  { %592 = vmatpush1.msra.mxu0 %v2291_v6  ;;  %663 = vmatpush1.msra.mxu1 %v2298_v8 }
 0x109   :  { %593 = vmatprep.subr.mxu0 %v2294_v7  ;;  %664 = vmatprep.subr.mxu1 %v2303_v10 }
 0x10a   :  { %594 = vmatpush1.msra.mxu0 %v2300_v9  ;;  %665 = vmatpush1.msra.mxu1 %v2309_v12 }
 0x10b   :  { %595 = vmatprep.subr.mxu0 %v2305_v11  ;;  %666 = vmatprep.subr.mxu1 %v2315_v14 }
 0x10c   :  { %596 = vmatpush1.msra.mxu0 %v2311_v13  ;;  %667 = vmatpush1.msra.mxu1 %v2321_v16 }
 0x10d   :  { %597 = vmatprep.subr.mxu0 %v2317_v15  ;;  %668 = vmatprep.subr.mxu1 %v2327_v18 }
 0x10e   :  { %598 = vmatpush1.msra.mxu0 %v2323_v17  ;;  %669 = vmatpush1.msra.mxu1 %v2333_v20 }
 0x10f   :  { %599 = vmatprep.subr.mxu0 %v2329_v19  ;;  %670 = vmatprep.subr.mxu1 %v2339_v22 }
 0x110   :  { %600 = vmatpush1.msra.mxu0 %v2335_v21  ;;  %671 = vmatpush1.msra.mxu1 %v2345_v24 }
 0x111   :  { %601 = vmatprep.subr.mxu0 %v2341_v23  ;;  %672 = vmatprep.subr.mxu1 %v2351_v26 }
 0x112   :  { %602 = vmatpush1.msra.mxu0 %v2347_v25  ;;  %673 = vmatpush1.msra.mxu1 %v2357_v28 }
 0x113   :  { %603 = vmatprep.subr.mxu0 %v2353_v27  ;;  %674 = vmatprep.subr.mxu1 %v2363_v30 }
 0x114   :  { %604 = vmatpush1.msra.mxu0 %v2359_v29  ;;  %675 = vmatpush1.msra.mxu1 %v2369_v32 }
 0x115   :  { %605 = vmatprep.subr.mxu0 %v2365_v31  ;;  %676 = vmatprep.subr.mxu1 %v2373_v33 }
 0x116   :  { %606 = vmatpush1.msra.mxu0 %v2380_v34  ;;  %677 = vmatpush1.msra.mxu1 %v2382_v35 }
 0x117   :  { %607 = vmatprep.subr.mxu0 %v2386_v36  ;;  %678 = vmatprep.subr.mxu1 %v2388_v37 }
 0x118   :  { %608 = vmatpush1.msra.mxu0 %v2392_v38  ;;  %679 = vmatpush1.msra.mxu1 %v2394_v39 }
 0x119   :  { %609 = vmatprep.subr.mxu0 %v2398_v40  ;;  %680 = vmatprep.subr.mxu1 %v2400_v41 }
 0x11a   :  { %610 = vmatpush1.msra.mxu0 %v2404_v42  ;;  %681 = vmatpush1.msra.mxu1 %v2406_v43 }
 0x11b   :  { %611 = vmatprep.subr.mxu0 %v2408_v44  ;;  %682 = vmatprep.subr.mxu1 %v2412_v45 }
 0x11c   :  { %612 = vmatpush1.msra.mxu0 %v2414_v46  ;;  %683 = vmatpush1.msra.mxu1 %v2416_v47 }
 0x11d   :  { %613 = vmatprep.subr.mxu0 %v2420_v48  ;;  %684 = vmatprep.subr.mxu1 %v2422_v49 }
 0x11e   :  { %614 = vmatpush1.msra.mxu0 %v2424_v50  ;;  %685 = vmatpush1.msra.mxu1 %v2428_v51 }
 0x11f   :  { %615 = vmatprep.subr.mxu0 %v2430_v52  ;;  %686 = vmatprep.subr.mxu1 %v2432_v53 }
 0x120   :  { %616 = vmatpush1.msra.mxu0 %v2436_v54  ;;  %687 = vmatpush1.msra.mxu1 %v2438_v55 }
 0x121   :  { %617 = vmatprep.subr.mxu0 %v2442_v56  ;;  %688 = vmatprep.subr.mxu1 %v2444_v57  ;;  %v2590_v57 = vld [vmem:[%s3299_s8] sm:$0xf]  ;;  %v308_v56 = vld [vmem:[#allocation7] sm:$0x7] }
 0x122   :  { %618 = vmatpush1.msra.mxu0 %v2448_v58  ;;  %689 = vmatpush1.msra.mxu1 %v2450_v59  ;;  %v3492_v59 = vld [vmem:[#allocation15_spill] sm:$0xff] }
 0x123   :  { %619 = vmatprep.subr.mxu0 %v3483_v4  ;;  %690 = vmatprep.subr.mxu1 %v3484_v60  ;;  %v3493_v4 = vld [vmem:[#allocation16_spill] sm:$0xff]  ;;  %v3329_v60 = vlaneseq }
 0x124   :  { %620 = vmatpush1.msra.mxu0 %v3485_v62  ;;  %691 = vmatpush1.msra.mxu1 %v3486_v63 }
 0x125   :  { %621 = vmatprep.subr.mxu0 %v3487_v1  ;;  %692 = vmatprep.subr.mxu1 %v3488_v2  ;;  %v2565_v62 = vshrl.u32 %v3329_v60, 7  ;;  %v273_v2 = vld [vmem:[%s3296_s5] ss:$2 sm:$0x7] }
 0x126   :  { %622 = vmatpush1.msra.mxu0 %v3489_v3  ;;  %655 = vmatprep.mubr.f32.mxu0 %v3490_v5  ;;  %v1911_v3 = vld [vmem:[%s3296_s5 + $0x1] ss:$2 sm:$0x7]  ;;  %s2211_s5 = smov [#allocation10]  }
 0x127   :  { %693 = vmatpush1.msra.mxu1 %v3491_v0  ;;  %726 = vmatprep.mubr.f32.mxu1 %v3490_v5  ;;  %v2574_v0 = vsub.s32 0, %v2565_v62  ;;  %v2583_v5 = vsub.s32 1, %v2565_v62  ;;  %s1891_s8 = sshll.u32 %s2211_s5, 4  ;;  %s1892_s8 = int_to_ptr.vmem [resolvable:$true] %s1891_s8 }
 0x128   :  { %792 = vmatprep.subr.mxu0 %v3492_v59  ;;  %863 = vmatprep.subr.mxu1 %v3493_v4  ;;  %s2173_s17 = scalar_lea.vmem %s1892_s8, 64  ;;  %p2178_p7 = scmp.lt.s32.totalorder %s1892_s8, %s1892_s8 }
 0x129   :  { %3494 = vst [vmem:[#allocation47_spill] sm:$0xff] %v2574_v0  ;;  %v2577_v59 = vrot.slane %v273_v2, %v2574_v0  ;;  %v2580_v4 = vrot.slane %v1911_v3, %v2574_v0  ;;  %3497 = vst [vmem:[#allocation50_spill] sm:$0xff] %v2583_v5  ;;  %v2593_v55 = vrot.slane %v273_v2, %v2583_v5  ;;  %p2174_p6 = scmp.ne.s32.totalorder %s1892_s8, %s2173_s17  ;;  %p2179_p8 = scmp.lt.s32.totalorder %s2173_s17, %s2173_s17 }
 0x12a   :  { %v2596_v54 = vrot.slane %v1911_v3, %v2583_v5  ;;  %v2600_v52 = vrot.slane %v2590_v57, %v2574_v0 }
 0x12b   :  { %3495 = vst [vmem:[#allocation48_spill] sm:$0xff] %v2577_v59  ;;  %3496 = vst [vmem:[#allocation49_spill] sm:$0xff] %v2580_v4  ;;  %p2180_p9 = por %p2179_p8, %p2178_p7 }
 0x12c   :  { %3498 = vst [vmem:[#allocation51_spill] sm:$0xff] %v2593_v55  ;;  %3499 = vst [vmem:[#allocation52_spill] sm:$0xff] %v2596_v54 }
 0x12d   :  { %3500 = vst [vmem:[#allocation53_spill] sm:$0xff] %v2600_v52  ;;  %p2181_p10 = pnand %p2180_p9, %p2174_p6 }
 0x178   :  { %v533_v63 = vpop.permute.xlu0 %532 }
 0x179   :  { %v535_v1 = vmul.f32 %v533_v63, %v2577_v59  ;;  %v2603_v59 = vrot.slane %v308_v56, %v2574_v0  ;;  %v2614_v0 = vrot.slane %v308_v56, %v2583_v5 }
 0x17b   :  { %3501 = vst [vmem:[#allocation54_spill] sm:$0xff] %v2603_v59 }
 0x17d   :  { %v540_v60 = vpop.permute.xlu0 %539 }
 0x17e   :  { %v542_v58 = vmul.f32 %v540_v60, %v2580_v4  ;;  %v536_v4 = vmul.f32 %v533_v63, %v2593_v55  ;;  %v543_v51 = vmul.f32 %v540_v60, %v2596_v54 }
 0x180   :  { %v545_v53 = vadd.f32 %v542_v58, %v535_v1  ;;  %v2611_v58 = vrot.slane %v2590_v57, %v2583_v5  ;;  %v546_v45 = vadd.f32 %v543_v51, %v536_v4 }
 0x182   :  { %v548_v47 = vadd.f32 %v545_v53, %v2603_v59  ;;  %v549_v43 = vadd.f32 %v546_v45, %v2614_v0  ;;  %v263_v59 = vsub.s32 2, %v2565_v62 }
 0x184   :  { %v2628_v45 = vrot.slane %v308_v56, %v263_v59  ;;  %v3503_v56 = vld [vmem:[#allocation21_spill] sm:$0xff] }
 0x1c7   :  { %v455_v50 = vpop.f32.mrf.mxu0  ;;  %v526_v49 = vpop.f32.mrf.mxu1 }
 0x1c8   :  { %v456_v48 = vadd.f32 %v455_v50, %v2600_v52 }
 0x1c9   :  { %v457_v1 = vpop.f32.mrf.mxu0  ;;  %v528_v46 = vpop.f32.mrf.mxu1 }
 0x1ca   :  { %v570_v44 = vadd.f32 %v548_v47, %v456_v48  ;;  %v458_v54 = vadd.f32 %v457_v1, %v2611_v58  ;;  %v2619_v46 = vrot.slane %v273_v2, %v263_v59  ;;  %v2621_v47 = vrot.slane %v1911_v3, %v263_v59 }
 0x1cc   :  { %v1912_v55 = vmul.f32 -1.442695, %v570_v44  ;;  %v577_v50 = vadd.f32 %v549_v43, %v458_v54  ;;  %v537_v48 = vmul.f32 %v533_v63, %v2619_v46  ;;  %v544_v44 = vmul.f32 %v540_v60, %v2621_v47 }
 0x1ce   :  { %1959 = vpow2.f32 %v1912_v55  ;;  %v1913_v52 = vmul.f32 -1.442695, %v577_v50  ;;  %v2626_v55 = vrot.slane %v2590_v57, %v263_v59  ;;  %v547_v43 = vadd.f32 %v544_v44, %v537_v48  ;;  %v3504_v59 = vld [vmem:[#allocation22_spill] sm:$0xff]  ;;  %v3506_v48 = vld [vmem:[#allocation24_spill] sm:$0xff]  ;;  %v3507_v44 = vld [vmem:[#allocation25_spill] sm:$0xff] }
 0x1d0   :  { %1961 = vpow2.f32 %v1913_v52  ;;  %v527_v54 = vadd.f32 %v526_v49, %v2626_v55  ;;  %v3502_v49 = vld [vmem:[#allocation20_spill] sm:$0xff] }
 0x1db   :  { %v1960_v53 = vpop.eup %1959 }
 0x1dc   :  { %v574_v42 = vadd.f32 1.0, %v1960_v53 }
 0x1dd   :  { %v1962_v51 = vpop.eup %1961 }
 0x1de   :  { %1963 = vrcp.f32 %v574_v42  ;;  %v581_v52 = vadd.f32 1.0, %v1962_v51  ;;  %v550_v42 = vadd.f32 %v547_v43, %v2628_v45  ;;  %v3508_v51 = vld [vmem:[#allocation26_spill] sm:$0xff]  ;;  %v3509_v43 = vld [vmem:[#allocation27_spill] sm:$0xff] }
 0x1e0   :  { %1965 = vrcp.f32 %v581_v52  ;;  %v3510_v52 = vld [vmem:[#allocation28_spill] sm:$0xff] }
 0x1eb   :  { %v1964_v4 = vpop.eup %1963 }
 0x1ec   :  { %v584_v2 = vmul.f32 %v1964_v4, %v527_v54  ;;  %v3511_v54 = vld [vmem:[#allocation29_spill] sm:$0xff]  ;;  %v3512_v4 = vld [vmem:[#allocation30_spill] sm:$0xff] }
 0x1ed   :  { %v1966_v63 = vpop.eup %1965 }
 0x1ee   :  { %v585_v3 = vadd.f32 %v584_v2, %v550_v42  ;;  %v587_v1 = vsub.f32 1.0, %v1966_v63  ;;  %v589_v53 = vmul.f32 %v1966_v63, %v2494_v61  ;;  %v3505_v61 = vld [vmem:[#allocation23_spill] sm:$0xff]  ;;  %v3514_v2 = vld [vmem:[#allocation32_spill] sm:$0xff]  ;;  %v3516_v63 = vld [vmem:[#allocation34_spill] sm:$0xff] }
 0x1ef   :  { %v3513_v42 = vld [vmem:[#allocation31_spill] sm:$0xff] }
 0x1f0   :  { %1967 = vtanh.f32 %v585_v3  ;;  %v3515_v3 = vld [vmem:[#allocation33_spill] sm:$0xff] }
 0x1fd   :  { %v1968_v60 = vpop.eup %1967 }
 0x1fe   :  { %v588_v50 = vmul.f32 %v1968_v60, %v587_v1  ;;  %v3517_v1 = vld [vmem:[#allocation35_spill] sm:$0xff]  ;;  %v3518_v60 = vld [vmem:[#allocation36_spill] sm:$0xff] }
 0x200   :  { %v2633_v5 = vadd.f32 %v589_v53, %v588_v50  ;;  %v3519_v50 = vld [vmem:[#allocation37_spill] sm:$0xff]  ;;  %v3520_v53 = vld [vmem:[#allocation38_spill] sm:$0xff] }
 0x202   :  { %656 = vmatmul.mubr.f32.vlgmr.msra.gmra.mxu0 %v2633_v5  ;;  %727 = vmatmul.mubr.f32.vlgmr.msra.gmra.mxu1 %v2633_v5 }
 0x203   :  { %793 = vmatpush1.msra.mxu0 %v2291_v6  ;;  %864 = vmatpush1.msra.mxu1 %v2298_v8 }
 0x204   :  { %794 = vmatprep.subr.mxu0 %v2294_v7  ;;  %865 = vmatprep.subr.mxu1 %v2303_v10 }
 0x205   :  { %795 = vmatpush1.msra.mxu0 %v2300_v9  ;;  %866 = vmatpush1.msra.mxu1 %v2309_v12 }
 0x206   :  { %796 = vmatprep.subr.mxu0 %v2305_v11  ;;  %867 = vmatprep.subr.mxu1 %v2315_v14 }
 0x207   :  { %797 = vmatpush1.msra.mxu0 %v2311_v13  ;;  %868 = vmatpush1.msra.mxu1 %v2321_v16 }
 0x208   :  { %798 = vmatprep.subr.mxu0 %v2317_v15  ;;  %869 = vmatprep.subr.mxu1 %v2327_v18 }
 0x209   :  { %799 = vmatpush1.msra.mxu0 %v2323_v17  ;;  %870 = vmatpush1.msra.mxu1 %v2333_v20 }
 0x20a   :  { %800 = vmatprep.subr.mxu0 %v2329_v19  ;;  %871 = vmatprep.subr.mxu1 %v2339_v22 }
 0x20b   :  { %801 = vmatpush1.msra.mxu0 %v2335_v21  ;;  %872 = vmatpush1.msra.mxu1 %v2345_v24 }
 0x20c   :  { %802 = vmatprep.subr.mxu0 %v2341_v23  ;;  %873 = vmatprep.subr.mxu1 %v2351_v26 }
 0x20d   :  { %803 = vmatpush1.msra.mxu0 %v2347_v25  ;;  %874 = vmatpush1.msra.mxu1 %v2357_v28 }
 0x20e   :  { %804 = vmatprep.subr.mxu0 %v2353_v27  ;;  %875 = vmatprep.subr.mxu1 %v2363_v30 }
 0x20f   :  { %805 = vmatpush1.msra.mxu0 %v2359_v29  ;;  %876 = vmatpush1.msra.mxu1 %v2369_v32 }
 0x210   :  { %806 = vmatprep.subr.mxu0 %v2365_v31  ;;  %877 = vmatprep.subr.mxu1 %v2373_v33 }
 0x211   :  { %807 = vmatpush1.msra.mxu0 %v2380_v34  ;;  %878 = vmatpush1.msra.mxu1 %v2382_v35 }
 0x212   :  { %808 = vmatprep.subr.mxu0 %v2386_v36  ;;  %879 = vmatprep.subr.mxu1 %v2388_v37 }
 0x213   :  { %809 = vmatpush1.msra.mxu0 %v2392_v38  ;;  %880 = vmatpush1.msra.mxu1 %v2394_v39 }
 0x214   :  { %810 = vmatprep.subr.mxu0 %v2398_v40  ;;  %881 = vmatprep.subr.mxu1 %v2400_v41 }
 0x215   :  { %811 = vmatpush1.msra.mxu0 %v3502_v49  ;;  %882 = vmatpush1.msra.mxu1 %v3503_v56 }
 0x216   :  { %812 = vmatprep.subr.mxu0 %v3504_v59  ;;  %883 = vmatprep.subr.mxu1 %v3505_v61 }
 0x217   :  { %813 = vmatpush1.msra.mxu0 %v3506_v48  ;;  %884 = vmatpush1.msra.mxu1 %v3507_v44  ;;  %v3538_v44 = vld [vmem:[#allocation51_spill] sm:$0xff]  ;;  %v3539_v48 = vld [vmem:[#allocation53_spill] sm:$0xff] }
 0x218   :  { %814 = vmatprep.subr.mxu0 %v3508_v51  ;;  %885 = vmatprep.subr.mxu1 %v3509_v43 }
 0x219   :  { %815 = vmatpush1.msra.mxu0 %v3510_v52  ;;  %886 = vmatpush1.msra.mxu1 %v3511_v54  ;;  %v3521_v52 = vld [vmem:[#allocation39_spill] sm:$0xff]  ;;  %v3522_v54 = vld [vmem:[#allocation40_spill] sm:$0xff] }
 0x21a   :  { %816 = vmatprep.subr.mxu0 %v3512_v4  ;;  %887 = vmatprep.subr.mxu1 %v3513_v42  ;;  %v3523_v4 = vld [vmem:[#allocation41_spill] sm:$0xff]  ;;  %v3524_v42 = vld [vmem:[#allocation42_spill] sm:$0xff] }
 0x21b   :  { %817 = vmatpush1.msra.mxu0 %v3514_v2  ;;  %888 = vmatpush1.msra.mxu1 %v3515_v3  ;;  %v3525_v2 = vld [vmem:[#allocation43_spill] sm:$0xff]  ;;  %v3526_v3 = vld [vmem:[#allocation44_spill] sm:$0xff] }
 0x21c   :  { %818 = vmatprep.subr.mxu0 %v3516_v63  ;;  %889 = vmatprep.subr.mxu1 %v3517_v1  ;;  %v3527_v63 = vmov 0.0   ;;  %v3528_v1 = vld [vmem:[#allocation45_spill] sm:$0xff] }
 0x21d   :  { %819 = vmatpush1.msra.mxu0 %v3518_v60  ;;  %890 = vmatpush1.msra.mxu1 %v3519_v50  ;;  %v3529_v50 = vld [vmem:[#allocation15_spill] sm:$0xff]  ;;  %v3536_v60 = vld [vmem:[#allocation49_spill] sm:$0xff] }
 0x21e   :  { %820 = vmatprep.subr.mxu0 %v3520_v53  ;;  %891 = vmatprep.subr.mxu1 %v3521_v52  ;;  %v3530_v53 = vld [vmem:[#allocation16_spill] sm:$0xff] }
 0x21f   :  { %821 = vmatpush1.msra.mxu0 %v3522_v54  ;;  %892 = vmatpush1.msra.mxu1 %v3523_v4  ;;  %v267_v54 = vsub.s32 3, %v2565_v62 }
 0x220   :  { %822 = vmatprep.subr.mxu0 %v3524_v42  ;;  %893 = vmatprep.subr.mxu1 %v3525_v2 }
 0x221   :  { %823 = vmatpush1.msra.mxu0 %v3526_v3  ;;  %856 = vmatprep.mubr.f32.mxu0 %v3527_v63  ;;  %v2705_v4 = vrot.slane %v2590_v57, %v267_v54  ;;  %v3533_v3 = vmov 1   ;;  %v3537_v54 = vld [vmem:[#allocation52_spill] sm:$0xff] }
 0x222   :  { %894 = vmatpush1.msra.mxu1 %v3528_v1  ;;  %927 = vmatprep.mubr.f32.mxu1 %v3527_v63  ;;  %v3534_v1 = vmov 0   ;;  %v3535_v63 = vld [vmem:[#allocation48_spill] sm:$0xff] }
 0x223   :  { %993 = vmatprep.subr.mxu0 %v3529_v50  ;;  %1064 = vmatprep.subr.mxu1 %v3530_v53  ;;  %3531 = vst [vmem:[#allocation55_spill] sm:$0xff] %v2705_v4 }
 0x2c2   :  { %v728_v42 = vpop.f32.mrf.mxu1  ;;  %v657_v51 = vpop.f32.mrf.mxu0 }
 0x2c3   :  { %v658_v61 = vadd.f32 %v657_v51, %v3539_v48 }
 0x2c4   :  { %v730_v52 = vpop.f32.mrf.mxu1  ;;  %v659_v49 = vpop.f32.mrf.mxu0 }
 0x2c5   :  { %v2708_v2 = vadd.f32 %v730_v52, %v2705_v4 }
 0x2c7   :  { %3532 = vst [vmem:[#allocation56_spill] sm:$0xff] %v2708_v2  ;;  %735 = vperm.xlu1 %1954, %v2708_v2  }
 0x2cb   :  { %1955 = vset.pattern.permute.xlu1 %v3533_v3  ;;  %v3540_v3 = vld [vmem:[#allocation54_spill] sm:$0xff] }
 0x2cc   :  { %742 = vperm.xlu1 %1955, %v2708_v2  }
 0x2d0   :  { %1956 = vset.pattern.permute.xlu1 %v3534_v1 }
 0x342   :  { %v736_v50 = vpop.permute.xlu1 %735 }
 0x343   :  { %v738_v62 = vmul.f32 %v736_v50, %v3535_v63  ;;  %v739_v52 = vmul.f32 %v736_v50, %v3538_v44  ;;  %v660_v63 = vadd.f32 %v659_v49, %v2611_v58 }
 0x347   :  { %v743_v53 = vpop.permute.xlu1 %742 }
 0x348   :  { %v745_v57 = vmul.f32 %v743_v53, %v3536_v60  ;;  %v746_v43 = vmul.f32 %v743_v53, %v3537_v54 }
 0x34a   :  { %v748_v4 = vadd.f32 %v745_v57, %v738_v62  ;;  %v749_v59 = vadd.f32 %v746_v43, %v739_v52  ;;  %v747_v62 = vmul.f32 %v743_v53, %v2621_v47  ;;  %v740_v43 = vmul.f32 %v736_v50, %v2619_v46  ;;  %v3546_v50 = vld [vmem:[#allocation22_spill] sm:$0xff]  ;;  %v3548_v52 = vld [vmem:[#allocation24_spill] sm:$0xff] }
 0x34c   :  { %v751_v56 = vadd.f32 %v748_v4, %v3540_v3  ;;  %v752_v1 = vadd.f32 %v749_v59, %v2614_v0  ;;  %v750_v4 = vadd.f32 %v747_v62, %v740_v43  ;;  %v3550_v62 = vld [vmem:[#allocation26_spill] sm:$0xff]  ;;  %v3552_v43 = vld [vmem:[#allocation28_spill] sm:$0xff] }
 0x34e   :  { %v771_v2 = vadd.f32 %v751_v56, %v658_v61  ;;  %v778_v60 = vadd.f32 %v752_v1, %v660_v63  ;;  %v729_v61 = vadd.f32 %v728_v42, %v2626_v55  ;;  %v3545_v42 = vld [vmem:[#allocation21_spill] sm:$0xff] }
 0x34f   :  { %v3549_v1 = vld [vmem:[#allocation25_spill] sm:$0xff] }
 0x350   :  { %v1914_v41 = vmul.f32 -1.442695, %v771_v2  ;;  %v1915_v40 = vmul.f32 -1.442695, %v778_v60  ;;  %v753_v2 = vadd.f32 %v750_v4, %v2628_v45  ;;  %v3553_v4 = vld [vmem:[#allocation29_spill] sm:$0xff] }
 0x352   :  { %1969 = vpow2.f32 %v1914_v41 }
 0x353   :  { %1971 = vpow2.f32 %v1915_v40 }
 0x35f   :  { %v1970_v54 = vpop.eup %1969 }
 0x360   :  { %v775_v39 = vadd.f32 1.0, %v1970_v54  ;;  %v1972_v51 = vpop.eup %1971  ;;  %v3547_v54 = vld [vmem:[#allocation23_spill] sm:$0xff] }
 0x361   :  { %v782_v56 = vadd.f32 1.0, %v1972_v51  ;;  %v3551_v51 = vld [vmem:[#allocation27_spill] sm:$0xff] }
 0x362   :  { %1973 = vrcp.f32 %v775_v39 }
 0x363   :  { %1975 = vrcp.f32 %v782_v56  ;;  %v3554_v56 = vld [vmem:[#allocation30_spill] sm:$0xff] }
 0x36f   :  { %v1974_v59 = vpop.eup %1973 }
 0x370   :  { %v785_v41 = vmul.f32 %v1974_v59, %v729_v61  ;;  %v1976_v40 = vpop.eup %1975  ;;  %v3555_v61 = vld [vmem:[#allocation31_spill] sm:$0xff]  ;;  %v3556_v59 = vld [vmem:[#allocation32_spill] sm:$0xff] }
 0x371   :  { %v788_v63 = vsub.f32 1.0, %v1976_v40  ;;  %v790_v53 = vmul.f32 %v1976_v40, %v2633_v5  ;;  %v3541_v5 = vld [vmem:[#allocation17_spill] sm:$0xff]  ;;  %v3560_v40 = vld [vmem:[#allocation36_spill] sm:$0xff] }
 0x372   :  { %v786_v49 = vadd.f32 %v785_v41, %v753_v2  ;;  %v3557_v2 = vld [vmem:[#allocation33_spill] sm:$0xff]  ;;  %v3558_v41 = vld [vmem:[#allocation34_spill] sm:$0xff] }
 0x374   :  { %1977 = vtanh.f32 %v786_v49  ;;  %v3559_v49 = vld [vmem:[#allocation35_spill] sm:$0xff] }
 0x381   :  { %v1978_v60 = vpop.eup %1977 }
 0x382   :  { %v789_v39 = vmul.f32 %v1978_v60, %v788_v63  ;;  %v3561_v63 = vld [vmem:[#allocation37_spill] sm:$0xff]  ;;  %v3562_v60 = vld [vmem:[#allocation38_spill] sm:$0xff] }
 0x384   :  { %v2727_v57 = vadd.f32 %v790_v53, %v789_v39  ;;  %v3563_v39 = vld [vmem:[#allocation39_spill] sm:$0xff]  ;;  %v3564_v53 = vld [vmem:[#allocation40_spill] sm:$0xff] }
 0x386   :  { %857 = vmatmul.mubr.f32.vlgmr.msra.gmra.mxu0 %v2727_v57  ;;  %928 = vmatmul.mubr.f32.vlgmr.msra.gmra.mxu1 %v2727_v57 }
 0x387   :  { %994 = vmatpush1.msra.mxu0 %v2291_v6  ;;  %1065 = vmatpush1.msra.mxu1 %v2298_v8  ;;  %v3542_v6 = vld [vmem:[#allocation18_spill] sm:$0xff] }
 0x388   :  { %995 = vmatprep.subr.mxu0 %v2294_v7  ;;  %1066 = vmatprep.subr.mxu1 %v2303_v10  ;;  %v3543_v7 = vld [vmem:[#allocation19_spill] sm:$0xff] }
 0x389   :  { %996 = vmatpush1.msra.mxu0 %v2300_v9  ;;  %1067 = vmatpush1.msra.mxu1 %v2309_v12  ;;  %v3544_v9 = vld [vmem:[#allocation20_spill] sm:$0xff] }
 0x38a   :  { %997 = vmatprep.subr.mxu0 %v2305_v11  ;;  %1068 = vmatprep.subr.mxu1 %v2315_v14 }
 0x38b   :  { %998 = vmatpush1.msra.mxu0 %v2311_v13  ;;  %1069 = vmatpush1.msra.mxu1 %v2321_v16 }
 0x38c   :  { %999 = vmatprep.subr.mxu0 %v2317_v15  ;;  %1070 = vmatprep.subr.mxu1 %v2327_v18 }
 0x38d   :  { %1000 = vmatpush1.msra.mxu0 %v2323_v17  ;;  %1071 = vmatpush1.msra.mxu1 %v2333_v20 }
 0x38e   :  { %1001 = vmatprep.subr.mxu0 %v2329_v19  ;;  %1072 = vmatprep.subr.mxu1 %v2339_v22 }
 0x38f   :  { %1002 = vmatpush1.msra.mxu0 %v2335_v21  ;;  %1073 = vmatpush1.msra.mxu1 %v2345_v24 }
 0x390   :  { %1003 = vmatprep.subr.mxu0 %v2341_v23  ;;  %1074 = vmatprep.subr.mxu1 %v2351_v26 }
 0x391   :  { %1004 = vmatpush1.msra.mxu0 %v2347_v25  ;;  %1075 = vmatpush1.msra.mxu1 %v2357_v28 }
 0x392   :  { %1005 = vmatprep.subr.mxu0 %v2353_v27  ;;  %1076 = vmatprep.subr.mxu1 %v2363_v30 }
 0x393   :  { %1006 = vmatpush1.msra.mxu0 %v2359_v29  ;;  %1077 = vmatpush1.msra.mxu1 %v2369_v32 }
 0x394   :  { %1007 = vmatprep.subr.mxu0 %v2365_v31  ;;  %1078 = vmatprep.subr.mxu1 %v2373_v33 }
 0x395   :  { %1008 = vmatpush1.msra.mxu0 %v2380_v34  ;;  %1079 = vmatpush1.msra.mxu1 %v2382_v35 }
 0x396   :  { %1009 = vmatprep.subr.mxu0 %v2386_v36  ;;  %1080 = vmatprep.subr.mxu1 %v2388_v37 }
 0x397   :  { %1010 = vmatpush1.msra.mxu0 %v2392_v38  ;;  %1081 = vmatpush1.msra.mxu1 %v3541_v5 }
 0x398   :  { %1011 = vmatprep.subr.mxu0 %v3542_v6  ;;  %1082 = vmatprep.subr.mxu1 %v3543_v7 }
 0x399   :  { %1012 = vmatpush1.msra.mxu0 %v3544_v9  ;;  %1083 = vmatpush1.msra.mxu1 %v3545_v42 }
 0x39a   :  { %1013 = vmatprep.subr.mxu0 %v3546_v50  ;;  %1084 = vmatprep.subr.mxu1 %v3547_v54 }
 0x39b   :  { %1014 = vmatpush1.msra.mxu0 %v3548_v52  ;;  %1085 = vmatpush1.msra.mxu1 %v3549_v1 }
 0x39c   :  { %1015 = vmatprep.subr.mxu0 %v3550_v62  ;;  %1086 = vmatprep.subr.mxu1 %v3551_v51 }
 0x39d   :  { %1016 = vmatpush1.msra.mxu0 %v3552_v43  ;;  %1087 = vmatpush1.msra.mxu1 %v3553_v4 }
 0x39e   :  { %1017 = vmatprep.subr.mxu0 %v3554_v56  ;;  %1088 = vmatprep.subr.mxu1 %v3555_v61  ;;  %v3565_v56 = vld [vmem:[#allocation41_spill] sm:$0xff]  ;;  %v3566_v61 = vld [vmem:[#allocation42_spill] sm:$0xff] }
 0x39f   :  { %1018 = vmatpush1.msra.mxu0 %v3556_v59  ;;  %1089 = vmatpush1.msra.mxu1 %v3557_v2  ;;  %v3567_v59 = vld [vmem:[#allocation43_spill] sm:$0xff]  ;;  %v3568_v2 = vld [vmem:[#allocation44_spill] sm:$0xff] }
 0x3a0   :  { %1019 = vmatprep.subr.mxu0 %v3558_v41  ;;  %1090 = vmatprep.subr.mxu1 %v3559_v49  ;;  %v3569_v41 = vmov 0.0   ;;  %v3570_v49 = vld [vmem:[#allocation45_spill] sm:$0xff] }
 0x3a1   :  { %1020 = vmatpush1.msra.mxu0 %v3560_v40  ;;  %1091 = vmatpush1.msra.mxu1 %v3561_v63  ;;  %v3571_v63 = vld [vmem:[#allocation15_spill] sm:$0xff] }
 0x3a2   :  { %1021 = vmatprep.subr.mxu0 %v3562_v60  ;;  %1092 = vmatprep.subr.mxu1 %v3563_v39  ;;  %v3572_v60 = vld [vmem:[#allocation16_spill] sm:$0xff]  ;;  %v3573_v40 = vld [vmem:[#allocation55_spill] sm:$0xff] }
 0x3a3   :  { %1022 = vmatpush1.msra.mxu0 %v3564_v53  ;;  %1093 = vmatpush1.msra.mxu1 %v3565_v56 }
 0x3a4   :  { %1023 = vmatprep.subr.mxu0 %v3566_v61  ;;  %1094 = vmatprep.subr.mxu1 %v3567_v59  ;;  %v3575_v61 = vld [vmem:[#allocation49_spill] sm:$0xff] }
 0x3a5   :  { %1024 = vmatpush1.msra.mxu0 %v3568_v2  ;;  %1057 = vmatprep.mubr.f32.mxu0 %v3569_v41 }
 0x3a6   :  { %1095 = vmatpush1.msra.mxu1 %v3570_v49  ;;  %1128 = vmatprep.mubr.f32.mxu1 %v3569_v41  ;;  %v3576_v49 = vld [vmem:[#allocation52_spill] sm:$0xff] }
 0x3a7   :  { %1194 = vmatprep.subr.mxu0 %v3571_v63  ;;  %1265 = vmatprep.subr.mxu1 %v3572_v60  ;;  %v3577_v41 = vld [vmem:[#allocation48_spill] sm:$0xff] }
 0x446   :  { %v929_v39 = vpop.f32.mrf.mxu1  ;;  %v858_v63 = vpop.f32.mrf.mxu0 }
 0x447   :  { %v859_v1 = vadd.f32 %v858_v63, %v3539_v48 }
 0x448   :  { %v931_v53 = vpop.f32.mrf.mxu1  ;;  %v860_v54 = vpop.f32.mrf.mxu0 }
 0x449   :  { %v2798_v56 = vadd.f32 %v931_v53, %v3573_v40 }
 0x44b   :  { %3574 = vst [vmem:[#allocation51_spill] sm:$0xff] %v2798_v56  ;;  %943 = vperm.xlu0 %1953, %v2798_v56   ;;  %936 = vperm.xlu1 %1956, %v2798_v56  }
 0x4c6   :  { %v944_v2 = vpop.permute.xlu0 %943  ;;  %v937_v59 = vpop.permute.xlu1 %936 }
 0x4c7   :  { %v946_v4 = vmul.f32 %v944_v2, %v3575_v61  ;;  %v947_v43 = vmul.f32 %v944_v2, %v3576_v49  ;;  %v939_v51 = vmul.f32 %v937_v59, %v3577_v41  ;;  %v940_v60 = vmul.f32 %v937_v59, %v3538_v44 }
 0x4c8   :  { %v861_v61 = vadd.f32 %v860_v54, %v2611_v58 }
 0x4c9   :  { %v949_v62 = vadd.f32 %v946_v4, %v939_v51  ;;  %v950_v53 = vadd.f32 %v947_v43, %v940_v60  ;;  %v948_v51 = vmul.f32 %v944_v2, %v2621_v47  ;;  %v941_v43 = vmul.f32 %v937_v59, %v2619_v46  ;;  %v2819_v59 = vld [vmem:[#allocation8 + $0x1e0] sm:$0xff] }
 0x4cb   :  { %v952_v40 = vadd.f32 %v949_v62, %v3540_v3  ;;  %v953_v56 = vadd.f32 %v950_v53, %v2614_v0  ;;  %v951_v62 = vadd.f32 %v948_v51, %v941_v43  ;;  %v3608_v53 = vld [vmem:[#allocation49_spill] sm:$0xff]  ;;  %v3609_v43 = vld [vmem:[#allocation52_spill] sm:$0xff] }
 0x4cd   :  { %v972_v52 = vadd.f32 %v952_v40, %v859_v1  ;;  %v979_v49 = vadd.f32 %v953_v56, %v861_v61  ;;  %v930_v40 = vadd.f32 %v929_v39, %v2626_v55  ;;  %v2827_v39 = vld [vmem:[#allocation8 + $0x1c0] sm:$0xff] }
 0x4cf   :  { %v1916_v50 = vmul.f32 -1.442695, %v972_v52  ;;  %v1917_v42 = vmul.f32 -1.442695, %v979_v49  ;;  %v954_v52 = vadd.f32 %v951_v62, %v2628_v45  ;;  %v2823_v49 = vld [vmem:[#allocation8 + $0x1c8] sm:$0xff] }
 0x4d0   :  { %v3610_v62 = vld [vmem:[#allocation48_spill] sm:$0xff] }
 0x4d1   :  { %1979 = vpow2.f32 %v1916_v50 }
 0x4d2   :  { %1981 = vpow2.f32 %v1917_v42 }
 0x4de   :  { %v1980_v41 = vpop.eup %1979 }
 0x4df   :  { %v976_v9 = vadd.f32 1.0, %v1980_v41  ;;  %v1982_v4 = vpop.eup %1981 }
 0x4e0   :  { %v983_v1 = vadd.f32 1.0, %v1982_v4 }
 0x4e1   :  { %1983 = vrcp.f32 %v976_v9 }
 0x4e2   :  { %1985 = vrcp.f32 %v983_v1 }
 0x4ee   :  { %v1984_v63 = vpop.eup %1983 }
 0x4ef   :  { %v986_v50 = vmul.f32 %v1984_v63, %v930_v40  ;;  %v1986_v42 = vpop.eup %1985 }
 0x4f0   :  { %v989_v56 = vsub.f32 1.0, %v1986_v42  ;;  %v991_v2 = vmul.f32 %v1986_v42, %v2727_v57 }
 0x4f1   :  { %v987_v54 = vadd.f32 %v986_v50, %v954_v52 }
 0x4f3   :  { %1987 = vtanh.f32 %v987_v54 }
 0x500   :  { %v1988_v61 = vpop.eup %1987 }
 0x501   :  { %v990_v9 = vmul.f32 %v1988_v61, %v989_v56 }
 0x503   :  { %v2815_v41 = vadd.f32 %v991_v2, %v990_v9 }
 0x505   :  { %1058 = vmatmul.mubr.f32.vlgmr.msra.gmra.mxu0 %v2815_v41  ;;  %1129 = vmatmul.mubr.f32.vlgmr.msra.gmra.mxu1 %v2815_v41 }
 0x506   :  { %1195 = vmatpush1.msra.mxu0 %v2819_v59  ;;  %1266 = vmatpush1.msra.mxu1 %v2298_v8  ;;  %v3578_v8 = vld [vmem:[#allocation20_spill] sm:$0xff] }
 0x507   :  { %1196 = vmatprep.subr.mxu0 %v2823_v49  ;;  %1267 = vmatprep.subr.mxu1 %v2303_v10  ;;  %v3579_v10 = vld [vmem:[#allocation21_spill] sm:$0xff] }
 0x508   :  { %1197 = vmatpush1.msra.mxu0 %v2827_v39  ;;  %1268 = vmatpush1.msra.mxu1 %v2309_v12  ;;  %v3581_v12 = vld [vmem:[#allocation23_spill] sm:$0xff] }
 0x509   :  { %1198 = vmatprep.subr.mxu0 %v2305_v11  ;;  %1269 = vmatprep.subr.mxu1 %v2315_v14  ;;  %v3580_v11 = vld [vmem:[#allocation22_spill] sm:$0xff]  ;;  %v3583_v14 = vld [vmem:[#allocation25_spill] sm:$0xff] }
 0x50a   :  { %1199 = vmatpush1.msra.mxu0 %v2311_v13  ;;  %1270 = vmatpush1.msra.mxu1 %v2321_v16  ;;  %v3582_v13 = vld [vmem:[#allocation24_spill] sm:$0xff]  ;;  %v3585_v16 = vld [vmem:[#allocation27_spill] sm:$0xff] }
 0x50b   :  { %1200 = vmatprep.subr.mxu0 %v2317_v15  ;;  %1271 = vmatprep.subr.mxu1 %v2327_v18  ;;  %v3584_v15 = vld [vmem:[#allocation26_spill] sm:$0xff]  ;;  %v3587_v18 = vld [vmem:[#allocation29_spill] sm:$0xff] }
 0x50c   :  { %1201 = vmatpush1.msra.mxu0 %v2323_v17  ;;  %1272 = vmatpush1.msra.mxu1 %v2333_v20  ;;  %v3586_v17 = vld [vmem:[#allocation28_spill] sm:$0xff]  ;;  %v3589_v20 = vld [vmem:[#allocation31_spill] sm:$0xff] }
 0x50d   :  { %1202 = vmatprep.subr.mxu0 %v2329_v19  ;;  %1273 = vmatprep.subr.mxu1 %v2339_v22  ;;  %v3588_v19 = vld [vmem:[#allocation30_spill] sm:$0xff]  ;;  %v3591_v22 = vld [vmem:[#allocation33_spill] sm:$0xff] }
 0x50e   :  { %1203 = vmatpush1.msra.mxu0 %v2335_v21  ;;  %1274 = vmatpush1.msra.mxu1 %v2345_v24  ;;  %v3590_v21 = vld [vmem:[#allocation32_spill] sm:$0xff]  ;;  %v3593_v24 = vld [vmem:[#allocation35_spill] sm:$0xff] }
 0x50f   :  { %1204 = vmatprep.subr.mxu0 %v2341_v23  ;;  %1275 = vmatprep.subr.mxu1 %v2351_v26  ;;  %v3592_v23 = vld [vmem:[#allocation34_spill] sm:$0xff]  ;;  %v3595_v26 = vld [vmem:[#allocation37_spill] sm:$0xff] }
 0x510   :  { %1205 = vmatpush1.msra.mxu0 %v2347_v25  ;;  %1276 = vmatpush1.msra.mxu1 %v2357_v28  ;;  %v3594_v25 = vld [vmem:[#allocation36_spill] sm:$0xff]  ;;  %v3597_v28 = vld [vmem:[#allocation39_spill] sm:$0xff] }
 0x511   :  { %1206 = vmatprep.subr.mxu0 %v2353_v27  ;;  %1277 = vmatprep.subr.mxu1 %v2363_v30  ;;  %v3596_v27 = vld [vmem:[#allocation38_spill] sm:$0xff]  ;;  %v3599_v30 = vld [vmem:[#allocation41_spill] sm:$0xff] }
 0x512   :  { %1207 = vmatpush1.msra.mxu0 %v2359_v29  ;;  %1278 = vmatpush1.msra.mxu1 %v2369_v32  ;;  %v3598_v29 = vld [vmem:[#allocation40_spill] sm:$0xff]  ;;  %v3601_v32 = vld [vmem:[#allocation43_spill] sm:$0xff] }
 0x513   :  { %1208 = vmatprep.subr.mxu0 %v2365_v31  ;;  %1279 = vmatprep.subr.mxu1 %v2373_v33  ;;  %v3600_v31 = vld [vmem:[#allocation42_spill] sm:$0xff]  ;;  %v3602_v33 = vld [vmem:[#allocation44_spill] sm:$0xff] }
 0x514   :  { %1209 = vmatpush1.msra.mxu0 %v2380_v34  ;;  %1280 = vmatpush1.msra.mxu1 %v2382_v35  ;;  %v3603_v34 = vmov 0.0   ;;  %v3604_v35 = vld [vmem:[#allocation45_spill] sm:$0xff] }
 0x515   :  { %1210 = vmatprep.subr.mxu0 %v2386_v36  ;;  %1281 = vmatprep.subr.mxu1 %v2388_v37  ;;  %v2889_v36 = vld [vmem:[#allocation8 + $0x1e8] sm:$0xff]  ;;  %v2892_v37 = vld [vmem:[#allocation8 + $0x1f8] sm:$0xff] }
 0x516   :  { %1211 = vmatpush1.msra.mxu0 %v2392_v38  ;;  %1282 = vmatpush1.msra.mxu1 %v3541_v5  ;;  %3605 = vst [vmem:[#allocation53_spill] sm:$0xff] %v2892_v37  ;;  %v3606_v5 = vld [vmem:[#allocation55_spill] sm:$0xff] }
 0x517   :  { %1212 = vmatprep.subr.mxu0 %v3542_v6  ;;  %1283 = vmatprep.subr.mxu1 %v3543_v7 }
 0x518   :  { %1213 = vmatpush1.msra.mxu0 %v3578_v8  ;;  %1284 = vmatpush1.msra.mxu1 %v3579_v10 }
 0x519   :  { %1214 = vmatprep.subr.mxu0 %v3580_v11  ;;  %1285 = vmatprep.subr.mxu1 %v3581_v12 }
 0x51a   :  { %1215 = vmatpush1.msra.mxu0 %v3582_v13  ;;  %1286 = vmatpush1.msra.mxu1 %v3583_v14 }
 0x51b   :  { %1216 = vmatprep.subr.mxu0 %v3584_v15  ;;  %1287 = vmatprep.subr.mxu1 %v3585_v16 }
 0x51c   :  { %1217 = vmatpush1.msra.mxu0 %v3586_v17  ;;  %1288 = vmatpush1.msra.mxu1 %v3587_v18 }
 0x51d   :  { %1218 = vmatprep.subr.mxu0 %v3588_v19  ;;  %1289 = vmatprep.subr.mxu1 %v3589_v20 }
 0x51e   :  { %1219 = vmatpush1.msra.mxu0 %v3590_v21  ;;  %1290 = vmatpush1.msra.mxu1 %v3591_v22 }
 0x51f   :  { %1220 = vmatprep.subr.mxu0 %v3592_v23  ;;  %1291 = vmatprep.subr.mxu1 %v3593_v24 }
 0x520   :  { %1221 = vmatpush1.msra.mxu0 %v3594_v25  ;;  %1292 = vmatpush1.msra.mxu1 %v3595_v26 }
 0x521   :  { %1222 = vmatprep.subr.mxu0 %v3596_v27  ;;  %1293 = vmatprep.subr.mxu1 %v3597_v28 }
 0x522   :  { %1223 = vmatpush1.msra.mxu0 %v3598_v29  ;;  %1294 = vmatpush1.msra.mxu1 %v3599_v30  ;;  %v2918_v30 = vld [vmem:[#allocation8 + $0x1f0] sm:$0xff] }
 0x523   :  { %1224 = vmatprep.subr.mxu0 %v3600_v31  ;;  %1295 = vmatprep.subr.mxu1 %v3601_v32  ;;  %v2922_v31 = vld [vmem:[#allocation8 + $0x1d8] sm:$0xff]  ;;  %v2929_v32 = vld [vmem:[#allocation8 + $0x1a8] sm:$0xff] }
 0x524   :  { %1225 = vmatpush1.msra.mxu0 %v3602_v33  ;;  %1258 = vmatprep.mubr.f32.mxu0 %v3603_v34  ;;  %v2932_v33 = vld [vmem:[#allocation8 + $0x1b8] sm:$0xff] }
 0x525   :  { %1296 = vmatpush1.msra.mxu1 %v3604_v35  ;;  %1329 = vmatprep.mubr.f32.mxu1 %v3603_v34  ;;  %v2935_v35 = vld [vmem:[#allocation8 + $0x1a0] sm:$0xff] }
 0x526   :  { %1395 = vmatprep.subr.mxu0 %v2889_v36  ;;  %1466 = vmatprep.subr.mxu1 %v2892_v37 }
 0x5c5   :  { %v1130_v38 = vpop.f32.mrf.mxu1  ;;  %v1059_v40 = vpop.f32.mrf.mxu0 }
 0x5c6   :  { %v1060_v50 = vadd.f32 %v1059_v40, %v3539_v48  ;;  %v1131_v19 = vadd.f32 %v1130_v38, %v2626_v55  ;;  %v2938_v38 = vld [vmem:[#allocation8 + $0x1b0] sm:$0xff]  ;;  %v2959_v40 = vld [vmem:[#allocation8 + $0x160] sm:$0xff] }
 0x5c7   :  { %v1132_v57 = vpop.f32.mrf.mxu1  ;;  %v1061_v61 = vpop.f32.mrf.mxu0 }
 0x5c8   :  { %v2896_v6 = vadd.f32 %v1132_v57, %v3606_v5  ;;  %v1062_v8 = vadd.f32 %v1061_v61, %v2611_v58  ;;  %v2941_v57 = vld [vmem:[#allocation8 + $0x188] sm:$0xff]  ;;  %v2980_v61 = vld [vmem:[#allocation8 + $0x138] sm:$0xff] }
 0x5ca   :  { %3607 = vst [vmem:[#allocation54_spill] sm:$0xff] %v2896_v6  ;;  %1144 = vperm.xlu0 %1953, %v2896_v6   ;;  %1137 = vperm.xlu1 %1956, %v2896_v6   ;;  %v3049_v6 = vld [vmem:[#allocation8 + $0x68] sm:$0xff] }
 0x5cb   :  { %3624 = vst [vmem:[#allocation28_spill] sm:$0xff] %v3049_v6 }
 0x645   :  { %v1145_v7 = vpop.permute.xlu0 %1144  ;;  %v1138_v60 = vpop.permute.xlu1 %1137 }
 0x646   :  { %v1147_v51 = vmul.f32 %v1145_v7, %v3608_v53  ;;  %v1148_v4 = vmul.f32 %v1145_v7, %v3609_v43  ;;  %v1140_v1 = vmul.f32 %v1138_v60, %v3610_v62  ;;  %v1141_v63 = vmul.f32 %v1138_v60, %v3538_v44 }
 0x647   :  { %v1149_v14 = vmul.f32 %v1145_v7, %v2621_v47  ;;  %v1142_v15 = vmul.f32 %v1138_v60, %v2619_v46  ;;  %v2944_v7 = vld [vmem:[#allocation8 + $0x198] sm:$0xff]  ;;  %v2947_v60 = vld [vmem:[#allocation8 + $0x180] sm:$0xff] }
 0x648   :  { %v1150_v52 = vadd.f32 %v1147_v51, %v1140_v1  ;;  %v1151_v54 = vadd.f32 %v1148_v4, %v1141_v63  ;;  %v2950_v51 = vld [vmem:[#allocation8 + $0x190] sm:$0xff]  ;;  %v2953_v4 = vld [vmem:[#allocation8 + $0x168] sm:$0xff]  ;;  %v2956_v1 = vld [vmem:[#allocation8 + $0x178] sm:$0xff] }
 0x649   :  { %v1152_v17 = vadd.f32 %v1149_v14, %v1142_v15  ;;  %v2962_v63 = vld [vmem:[#allocation8 + $0x170] sm:$0xff]  ;;  %v3004_v14 = vld [vmem:[#allocation8 + $0xf8] sm:$0xff]  ;;  %v3007_v15 = vld [vmem:[#allocation8 + $0xe0] sm:$0xff] }
 0x64a   :  { %v1153_v42 = vadd.f32 %v1150_v52, %v3540_v3  ;;  %v1154_v9 = vadd.f32 %v1151_v54, %v2614_v0  ;;  %v2965_v52 = vld [vmem:[#allocation8 + $0x148] sm:$0xff]  ;;  %v2971_v54 = vld [vmem:[#allocation8 + $0x140] sm:$0xff] }
 0x64b   :  { %v1155_v21 = vadd.f32 %v1152_v17, %v2628_v45  ;;  %v3013_v17 = vld [vmem:[#allocation8 + $0xc8] sm:$0xff] }
 0x64c   :  { %v1173_v56 = vadd.f32 %v1153_v42, %v1060_v50  ;;  %v1180_v10 = vadd.f32 %v1154_v9, %v1062_v8  ;;  %v2968_v50 = vld [vmem:[#allocation8 + $0x158] sm:$0xff]  ;;  %v2974_v42 = vld [vmem:[#allocation8 + $0x150] sm:$0xff]  ;;  %v2983_v9 = vld [vmem:[#allocation8 + $0x120] sm:$0xff]  ;;  %3612 = vst [vmem:[#allocation18_spill] sm:$0xff] %v3013_v17 }
 0x64d   :  { %v2989_v8 = vld [vmem:[#allocation8 + $0x108] sm:$0xff] }
 0x64e   :  { %v1918_v2 = vmul.f32 -1.442695, %v1173_v56  ;;  %v1919_v11 = vmul.f32 -1.442695, %v1180_v10  ;;  %v2977_v56 = vld [vmem:[#allocation8 + $0x128] sm:$0xff]  ;;  %v2992_v10 = vld [vmem:[#allocation8 + $0x118] sm:$0xff] }
 0x650   :  { %1989 = vpow2.f32 %v1918_v2  ;;  %v2986_v2 = vld [vmem:[#allocation8 + $0x130] sm:$0xff] }
 0x651   :  { %1991 = vpow2.f32 %v1919_v11  ;;  %v2995_v11 = vld [vmem:[#allocation8 + $0x100] sm:$0xff] }
 0x65d   :  { %v1990_v12 = vpop.eup %1989 }
 0x65e   :  { %v1177_v13 = vadd.f32 1.0, %v1990_v12  ;;  %v1992_v16 = vpop.eup %1991  ;;  %v2998_v12 = vld [vmem:[#allocation8 + $0x110] sm:$0xff] }
 0x65f   :  { %v1184_v18 = vadd.f32 1.0, %v1992_v16  ;;  %v3010_v16 = vld [vmem:[#allocation8 + $0xf0] sm:$0xff] }
 0x660   :  { %1993 = vrcp.f32 %v1177_v13  ;;  %v3001_v13 = vld [vmem:[#allocation8 + $0xe8] sm:$0xff]  ;;  %3611 = vst [vmem:[#allocation17_spill] sm:$0xff] %v3010_v16 }
 0x661   :  { %1995 = vrcp.f32 %v1184_v18  ;;  %v3016_v18 = vld [vmem:[#allocation8 + $0xd8] sm:$0xff] }
 0x662   :  { %3613 = vst [vmem:[#allocation19_spill] sm:$0xff] %v3016_v18 }
 0x66d   :  { %v1994_v20 = vpop.eup %1993 }
 0x66e   :  { %v1187_v22 = vmul.f32 %v1994_v20, %v1131_v19  ;;  %v1996_v24 = vpop.eup %1995  ;;  %v3019_v19 = vld [vmem:[#allocation8 + $0xc0] sm:$0xff]  ;;  %v3022_v20 = vld [vmem:[#allocation8 + $0xd0] sm:$0xff] }
 0x66f   :  { %v1190_v25 = vsub.f32 1.0, %v1996_v24  ;;  %v1192_v28 = vmul.f32 %v1996_v24, %v2815_v41  ;;  %v2926_v41 = vld [vmem:[#allocation8 + $0x1d0] sm:$0xff]  ;;  %3614 = vst [vmem:[#allocation15_spill] sm:$0xff] %v3019_v19  ;;  %3615 = vst [vmem:[#allocation16_spill] sm:$0xff] %v3022_v20 }
 0x670   :  { %v1188_v23 = vadd.f32 %v1187_v22, %v1155_v21  ;;  %v3025_v21 = vld [vmem:[#allocation8 + $0xa8] sm:$0xff]  ;;  %v3028_v22 = vld [vmem:[#allocation8 + $0xb8] sm:$0xff]  ;;  %v3034_v24 = vld [vmem:[#allocation8 + $0xb0] sm:$0xff] }
 0x671   :  { %3616 = vst [vmem:[#allocation20_spill] sm:$0xff] %v3025_v21  ;;  %3617 = vst [vmem:[#allocation21_spill] sm:$0xff] %v3028_v22 }
 0x672   :  { %1997 = vtanh.f32 %v1188_v23  ;;  %v3031_v23 = vld [vmem:[#allocation8 + $0xa0] sm:$0xff]  ;;  %3619 = vst [vmem:[#allocation23_spill] sm:$0xff] %v3034_v24 }
 0x673   :  { %3618 = vst [vmem:[#allocation22_spill] sm:$0xff] %v3031_v23 }
 0x67f   :  { %v1998_v26 = vpop.eup %1997 }
 0x680   :  { %v1191_v27 = vmul.f32 %v1998_v26, %v1190_v25  ;;  %v3037_v25 = vld [vmem:[#allocation8 + $0x88] sm:$0xff]  ;;  %v3040_v26 = vld [vmem:[#allocation8 + $0x98] sm:$0xff] }
 0x681   :  { %3620 = vst [vmem:[#allocation24_spill] sm:$0xff] %v3037_v25  ;;  %3621 = vst [vmem:[#allocation25_spill] sm:$0xff] %v3040_v26 }
 0x682   :  { %v2913_v29 = vadd.f32 %v1192_v28, %v1191_v27  ;;  %v3043_v27 = vld [vmem:[#allocation8 + $0x80] sm:$0xff]  ;;  %v3046_v28 = vld [vmem:[#allocation8 + $0x90] sm:$0xff] }
 0x683   :  { %3622 = vst [vmem:[#allocation26_spill] sm:$0xff] %v3043_v27  ;;  %3623 = vst [vmem:[#allocation27_spill] sm:$0xff] %v3046_v28 }
 0x684   :  { %1259 = vmatmul.mubr.f32.vlgmr.msra.gmra.mxu0 %v2913_v29  ;;  %1330 = vmatmul.mubr.f32.vlgmr.msra.gmra.mxu1 %v2913_v29 }
 0x685   :  { %1396 = vmatpush1.msra.mxu0 %v2819_v59  ;;  %1467 = vmatpush1.msra.mxu1 %v2918_v30 }
 0x686   :  { %1397 = vmatprep.subr.mxu0 %v2823_v49  ;;  %1468 = vmatprep.subr.mxu1 %v2922_v31 }
 0x687   :  { %1398 = vmatpush1.msra.mxu0 %v2827_v39  ;;  %1469 = vmatpush1.msra.mxu1 %v2926_v41 }
 0x688   :  { %1399 = vmatprep.subr.mxu0 %v2929_v32  ;;  %1470 = vmatprep.subr.mxu1 %v2932_v33 }
 0x689   :  { %1400 = vmatpush1.msra.mxu0 %v2935_v35  ;;  %1471 = vmatpush1.msra.mxu1 %v2938_v38 }
 0x68a   :  { %1401 = vmatprep.subr.mxu0 %v2941_v57  ;;  %1472 = vmatprep.subr.mxu1 %v2944_v7 }
 0x68b   :  { %1402 = vmatpush1.msra.mxu0 %v2947_v60  ;;  %1473 = vmatpush1.msra.mxu1 %v2950_v51 }
 0x68c   :  { %1403 = vmatprep.subr.mxu0 %v2953_v4  ;;  %1474 = vmatprep.subr.mxu1 %v2956_v1 }
 0x68d   :  { %1404 = vmatpush1.msra.mxu0 %v2959_v40  ;;  %1475 = vmatpush1.msra.mxu1 %v2962_v63 }
 0x68e   :  { %1405 = vmatprep.subr.mxu0 %v2965_v52  ;;  %1476 = vmatprep.subr.mxu1 %v2968_v50 }
 0x68f   :  { %1406 = vmatpush1.msra.mxu0 %v2971_v54  ;;  %1477 = vmatpush1.msra.mxu1 %v2974_v42 }
 0x690   :  { %1407 = vmatprep.subr.mxu0 %v2977_v56  ;;  %1478 = vmatprep.subr.mxu1 %v2980_v61 }
 0x691   :  { %1408 = vmatpush1.msra.mxu0 %v2983_v9  ;;  %1479 = vmatpush1.msra.mxu1 %v2986_v2 }
 0x692   :  { %1409 = vmatprep.subr.mxu0 %v2989_v8  ;;  %1480 = vmatprep.subr.mxu1 %v2992_v10 }
 0x693   :  { %1410 = vmatpush1.msra.mxu0 %v2995_v11  ;;  %1481 = vmatpush1.msra.mxu1 %v2998_v12 }
 0x694   :  { %1411 = vmatprep.subr.mxu0 %v3001_v13  ;;  %1482 = vmatprep.subr.mxu1 %v3004_v14 }
 0x695   :  { %1412 = vmatpush1.msra.mxu0 %v3007_v15  ;;  %1483 = vmatpush1.msra.mxu1 %v3010_v16 }
 0x696   :  { %1413 = vmatprep.subr.mxu0 %v3013_v17  ;;  %1484 = vmatprep.subr.mxu1 %v3016_v18 }
 0x697   :  { %1414 = vmatpush1.msra.mxu0 %v3019_v19  ;;  %1485 = vmatpush1.msra.mxu1 %v3022_v20 }
 0x698   :  { %1415 = vmatprep.subr.mxu0 %v3025_v21  ;;  %1486 = vmatprep.subr.mxu1 %v3028_v22 }
 0x699   :  { %1416 = vmatpush1.msra.mxu0 %v3031_v23  ;;  %1487 = vmatpush1.msra.mxu1 %v3034_v24  ;;  %v3052_v24 = vld [vmem:[#allocation8 + $0x78] sm:$0xff] }
 0x69a   :  { %1417 = vmatprep.subr.mxu0 %v3037_v25  ;;  %1488 = vmatprep.subr.mxu1 %v3040_v26  ;;  %3625 = vst [vmem:[#allocation29_spill] sm:$0xff] %v3052_v24  ;;  %v3055_v25 = vld [vmem:[#allocation8 + $0x60] sm:$0xff]  ;;  %v3058_v26 = vld [vmem:[#allocation8 + $0x70] sm:$0xff] }
 0x69b   :  { %1418 = vmatpush1.msra.mxu0 %v3043_v27  ;;  %1489 = vmatpush1.msra.mxu1 %v3046_v28  ;;  %3626 = vst [vmem:[#allocation30_spill] sm:$0xff] %v3055_v25  ;;  %3627 = vst [vmem:[#allocation31_spill] sm:$0xff] %v3058_v26  ;;  %v3061_v27 = vld [vmem:[#allocation8 + $0x48] sm:$0xff]  ;;  %v3064_v28 = vld [vmem:[#allocation8 + $0x58] sm:$0xff] }
 0x69c   :  { %1419 = vmatprep.subr.mxu0 %v3049_v6  ;;  %1490 = vmatprep.subr.mxu1 %v3052_v24  ;;  %3628 = vst [vmem:[#allocation32_spill] sm:$0xff] %v3061_v27  ;;  %3629 = vst [vmem:[#allocation33_spill] sm:$0xff] %v3064_v28  ;;  %v3067_v6 = vld [vmem:[#allocation8 + $0x40] sm:$0xff]  ;;  %v3070_v24 = vld [vmem:[#allocation8 + $0x50] sm:$0xff] }
 0x69d   :  { %1420 = vmatpush1.msra.mxu0 %v3055_v25  ;;  %1491 = vmatpush1.msra.mxu1 %v3058_v26  ;;  %3630 = vst [vmem:[#allocation34_spill] sm:$0xff] %v3067_v6  ;;  %3631 = vst [vmem:[#allocation35_spill] sm:$0xff] %v3070_v24  ;;  %v3073_v25 = vld [vmem:[#allocation8 + $0x28] sm:$0xff]  ;;  %v3076_v26 = vld [vmem:[#allocation8 + $0x38] sm:$0xff] }
 0x69e   :  { %1421 = vmatprep.subr.mxu0 %v3061_v27  ;;  %1492 = vmatprep.subr.mxu1 %v3064_v28  ;;  %3632 = vst [vmem:[#allocation36_spill] sm:$0xff] %v3073_v25  ;;  %3633 = vst [vmem:[#allocation37_spill] sm:$0xff] %v3076_v26  ;;  %v3079_v27 = vld [vmem:[#allocation8 + $0x20] sm:$0xff]  ;;  %v3082_v28 = vld [vmem:[#allocation8 + $0x30] sm:$0xff] }
 0x69f   :  { %1422 = vmatpush1.msra.mxu0 %v3067_v6  ;;  %1493 = vmatpush1.msra.mxu1 %v3070_v24  ;;  %3634 = vst [vmem:[#allocation38_spill] sm:$0xff] %v3079_v27  ;;  %3635 = vst [vmem:[#allocation39_spill] sm:$0xff] %v3082_v28  ;;  %v3085_v6 = vld [vmem:[#allocation8 + $0x8] sm:$0xff]  ;;  %v3088_v24 = vld [vmem:[#allocation8 + $0x18] sm:$0xff] }
 0x6a0   :  { %1423 = vmatprep.subr.mxu0 %v3073_v25  ;;  %1494 = vmatprep.subr.mxu1 %v3076_v26  ;;  %3636 = vst [vmem:[#allocation40_spill] sm:$0xff] %v3085_v6  ;;  %3637 = vst [vmem:[#allocation41_spill] sm:$0xff] %v3088_v24  ;;  %v3091_v25 = vld [vmem:[#allocation8] sm:$0xff]  ;;  %v3095_v26 = vld [vmem:[#allocation8 + $0x10] sm:$0xff] }
 0x6a1   :  { %1424 = vmatpush1.msra.mxu0 %v3079_v27  ;;  %1495 = vmatpush1.msra.mxu1 %v3082_v28  ;;  %3638 = vst [vmem:[#allocation42_spill] sm:$0xff] %v3091_v25  ;;  %3639 = vst [vmem:[#allocation43_spill] sm:$0xff] %v3095_v26 }
 0x6a2   :  { %1425 = vmatprep.subr.mxu0 %v3085_v6  ;;  %1496 = vmatprep.subr.mxu1 %v3088_v24 }
 0x6a3   :  { %1426 = vmatpush1.msra.mxu0 %v3091_v25  ;;  %1459 = vmatprep.mubr.f32.mxu0 %v3603_v34 }
 0x6a4   :  { %1497 = vmatpush1.msra.mxu1 %v3095_v26  ;;  %1530 = vmatprep.mubr.f32.mxu1 %v3603_v34 }
 0x6a5   :  { %1596 = vmatprep.subr.mxu0 %v2889_v36  ;;  %1667 = vmatprep.subr.mxu1 %v2892_v37 }
 0x744   :  { %v1331_v6 = vpop.f32.mrf.mxu1  ;;  %v1260_v36 = vpop.f32.mrf.mxu0 }
 0x745   :  { %v1261_v21 = vadd.f32 %v1260_v36, %v3539_v48  ;;  %v3662_v36 = vld [vmem:[#allocation36_spill] sm:$0xff] }
 0x746   :  { %v1333_v28 = vpop.f32.mrf.mxu1  ;;  %v1262_v19 = vpop.f32.mrf.mxu0 }
 0x747   :  { %v3102_v24 = vadd.f32 %v1333_v28, %v3606_v5 }
 0x749   :  { %3640 = vst [vmem:[#allocation44_spill] sm:$0xff] %v3102_v24  ;;  %1345 = vperm.xlu0 %1953, %v3102_v24   ;;  %1338 = vperm.xlu1 %1956, %v3102_v24  }
 0x7c4   :  { %v1346_v25 = vpop.permute.xlu0 %1345  ;;  %v1339_v27 = vpop.permute.xlu1 %1338 }
 0x7c5   :  { %v1348_v23 = vmul.f32 %v1346_v25, %v3608_v53  ;;  %v1349_v26 = vmul.f32 %v1346_v25, %v3609_v43  ;;  %v1341_v34 = vmul.f32 %v1339_v27, %v3610_v62  ;;  %v1342_v37 = vmul.f32 %v1339_v27, %v3538_v44 }
 0x7c6   :  { %v1263_v53 = vadd.f32 %v1262_v19, %v2611_v58 }
 0x7c7   :  { %v1351_v22 = vadd.f32 %v1348_v23, %v1341_v34  ;;  %v1352_v28 = vadd.f32 %v1349_v26, %v1342_v37  ;;  %v1350_v34 = vmul.f32 %v1346_v25, %v2621_v47  ;;  %v1343_v37 = vmul.f32 %v1339_v27, %v2619_v46  ;;  %v3660_v25 = vld [vmem:[#allocation34_spill] sm:$0xff]  ;;  %v3661_v27 = vld [vmem:[#allocation35_spill] sm:$0xff] }
 0x7c9   :  { %v1354_v5 = vadd.f32 %v1351_v22, %v3540_v3  ;;  %v1355_v24 = vadd.f32 %v1352_v28, %v2614_v0  ;;  %v1353_v22 = vadd.f32 %v1350_v34, %v1343_v37  ;;  %v3663_v28 = vld [vmem:[#allocation37_spill] sm:$0xff]  ;;  %v3664_v34 = vld [vmem:[#allocation38_spill] sm:$0xff]  ;;  %v3665_v37 = vld [vmem:[#allocation39_spill] sm:$0xff] }
 0x7cb   :  { %v1374_v20 = vadd.f32 %v1354_v5, %v1261_v21  ;;  %v1381_v43 = vadd.f32 %v1355_v24, %v1263_v53  ;;  %v1332_v21 = vadd.f32 %v1331_v6, %v2626_v55  ;;  %v3644_v6 = vld [vmem:[#allocation15_spill] sm:$0xff] }
 0x7cd   :  { %v1920_v18 = vmul.f32 -1.442695, %v1374_v20  ;;  %v1921_v17 = vmul.f32 -1.442695, %v1381_v43  ;;  %v1356_v20 = vadd.f32 %v1353_v22, %v2628_v45  ;;  %v3667_v22 = vld [vmem:[#allocation41_spill] sm:$0xff] }
 0x7cf   :  { %1999 = vpow2.f32 %v1920_v18 }
 0x7d0   :  { %2001 = vpow2.f32 %v1921_v17 }
 0x7dc   :  { %v2000_v62 = vpop.eup %1999 }
 0x7dd   :  { %v1378_v16 = vadd.f32 1.0, %v2000_v62  ;;  %v2002_v23 = vpop.eup %2001 }
 0x7de   :  { %v1385_v5 = vadd.f32 1.0, %v2002_v23  ;;  %v3666_v23 = vld [vmem:[#allocation40_spill] sm:$0xff] }
 0x7df   :  { %2003 = vrcp.f32 %v1378_v16 }
 0x7e0   :  { %2005 = vrcp.f32 %v1385_v5  ;;  %v3668_v5 = vld [vmem:[#allocation42_spill] sm:$0xff] }
 0x7ec   :  { %v2004_v26 = vpop.eup %2003 }
 0x7ed   :  { %v1388_v18 = vmul.f32 %v2004_v26, %v1332_v21  ;;  %v2006_v43 = vpop.eup %2005  ;;  %v3669_v21 = vmov 0.0   ;;  %v3670_v26 = vld [vmem:[#allocation43_spill] sm:$0xff] }
 0x7ee   :  { %v1391_v17 = vsub.f32 1.0, %v2006_v43  ;;  %v1393_v19 = vmul.f32 %v2006_v43, %v2913_v29  ;;  %v3645_v29 = vld [vmem:[#allocation16_spill] sm:$0xff]  ;;  %v3672_v43 = vld [vmem:[#allocation55_spill] sm:$0xff] }
 0x7ef   :  { %v1389_v53 = vadd.f32 %v1388_v18, %v1356_v20  ;;  %v3671_v20 = vld [vmem:[#allocation53_spill] sm:$0xff] }
 0x7f1   :  { %2007 = vtanh.f32 %v1389_v53 }
 0x7fe   :  { %v2008_v62 = vpop.eup %2007 }
 0x7ff   :  { %v1392_v16 = vmul.f32 %v2008_v62, %v1391_v17 }
 0x801   :  { %v3119_v24 = vadd.f32 %v1393_v19, %v1392_v16  ;;  %v3674_v19 = vld [vmem:[#allocation49_spill] sm:$0xff] }
 0x803   :  { %1460 = vmatmul.mubr.f32.vlgmr.msra.gmra.mxu0 %v3119_v24  ;;  %1531 = vmatmul.mubr.f32.vlgmr.msra.gmra.mxu1 %v3119_v24 }
 0x804   :  { %1597 = vmatpush1.msra.mxu0 %v2819_v59  ;;  %1668 = vmatpush1.msra.mxu1 %v2918_v30  ;;  %v3641_v59 = vld [vmem:[#allocation17_spill] sm:$0xff] }
 0x805   :  { %1598 = vmatprep.subr.mxu0 %v2823_v49  ;;  %1669 = vmatprep.subr.mxu1 %v2922_v31  ;;  %v3642_v49 = vld [vmem:[#allocation18_spill] sm:$0xff] }
 0x806   :  { %1599 = vmatpush1.msra.mxu0 %v2827_v39  ;;  %1670 = vmatpush1.msra.mxu1 %v2926_v41  ;;  %v3643_v39 = vld [vmem:[#allocation19_spill] sm:$0xff] }
 0x807   :  { %1600 = vmatprep.subr.mxu0 %v2929_v32  ;;  %1671 = vmatprep.subr.mxu1 %v2932_v33  ;;  %v3646_v32 = vld [vmem:[#allocation20_spill] sm:$0xff] }
 0x808   :  { %1601 = vmatpush1.msra.mxu0 %v2935_v35  ;;  %1672 = vmatpush1.msra.mxu1 %v2938_v38  ;;  %v3647_v35 = vld [vmem:[#allocation21_spill] sm:$0xff] }
 0x809   :  { %1602 = vmatprep.subr.mxu0 %v2941_v57  ;;  %1673 = vmatprep.subr.mxu1 %v2944_v7  ;;  %v3648_v57 = vld [vmem:[#allocation22_spill] sm:$0xff] }
 0x80a   :  { %1603 = vmatpush1.msra.mxu0 %v2947_v60  ;;  %1674 = vmatpush1.msra.mxu1 %v2950_v51  ;;  %v3649_v60 = vld [vmem:[#allocation23_spill] sm:$0xff] }
 0x80b   :  { %1604 = vmatprep.subr.mxu0 %v2953_v4  ;;  %1675 = vmatprep.subr.mxu1 %v2956_v1  ;;  %v3650_v4 = vld [vmem:[#allocation24_spill] sm:$0xff] }
 0x80c   :  { %1605 = vmatpush1.msra.mxu0 %v2959_v40  ;;  %1676 = vmatpush1.msra.mxu1 %v2962_v63  ;;  %v3651_v40 = vld [vmem:[#allocation25_spill] sm:$0xff] }
 0x80d   :  { %1606 = vmatprep.subr.mxu0 %v2965_v52  ;;  %1677 = vmatprep.subr.mxu1 %v2968_v50  ;;  %v3652_v52 = vld [vmem:[#allocation26_spill] sm:$0xff] }
 0x80e   :  { %1607 = vmatpush1.msra.mxu0 %v2971_v54  ;;  %1678 = vmatpush1.msra.mxu1 %v2974_v42  ;;  %v3653_v54 = vld [vmem:[#allocation27_spill] sm:$0xff] }
 0x80f   :  { %1608 = vmatprep.subr.mxu0 %v2977_v56  ;;  %1679 = vmatprep.subr.mxu1 %v2980_v61  ;;  %v3654_v56 = vld [vmem:[#allocation28_spill] sm:$0xff] }
 0x810   :  { %1609 = vmatpush1.msra.mxu0 %v2983_v9  ;;  %1680 = vmatpush1.msra.mxu1 %v2986_v2  ;;  %v3655_v9 = vld [vmem:[#allocation29_spill] sm:$0xff] }
 0x811   :  { %1610 = vmatprep.subr.mxu0 %v2989_v8  ;;  %1681 = vmatprep.subr.mxu1 %v2992_v10  ;;  %v3656_v8 = vld [vmem:[#allocation30_spill] sm:$0xff] }
 0x812   :  { %1611 = vmatpush1.msra.mxu0 %v2995_v11  ;;  %1682 = vmatpush1.msra.mxu1 %v2998_v12  ;;  %v3657_v11 = vld [vmem:[#allocation31_spill] sm:$0xff] }
 0x813   :  { %1612 = vmatprep.subr.mxu0 %v3001_v13  ;;  %1683 = vmatprep.subr.mxu1 %v3004_v14  ;;  %v3658_v13 = vld [vmem:[#allocation32_spill] sm:$0xff] }
 0x814   :  { %1613 = vmatpush1.msra.mxu0 %v3007_v15  ;;  %1684 = vmatpush1.msra.mxu1 %v3641_v59  ;;  %v3659_v15 = vld [vmem:[#allocation33_spill] sm:$0xff] }
 0x815   :  { %1614 = vmatprep.subr.mxu0 %v3642_v49  ;;  %1685 = vmatprep.subr.mxu1 %v3643_v39 }
 0x816   :  { %1615 = vmatpush1.msra.mxu0 %v3644_v6  ;;  %1686 = vmatpush1.msra.mxu1 %v3645_v29  ;;  %v3675_v6 = vld [vmem:[#allocation52_spill] sm:$0xff] }
 0x817   :  { %1616 = vmatprep.subr.mxu0 %v3646_v32  ;;  %1687 = vmatprep.subr.mxu1 %v3647_v35 }
 0x818   :  { %1617 = vmatpush1.msra.mxu0 %v3648_v57  ;;  %1688 = vmatpush1.msra.mxu1 %v3649_v60  ;;  %v3676_v57 = vld [vmem:[#allocation48_spill] sm:$0xff] }
 0x819   :  { %1618 = vmatprep.subr.mxu0 %v3650_v4  ;;  %1689 = vmatprep.subr.mxu1 %v3651_v40 }
 0x81a   :  { %1619 = vmatpush1.msra.mxu0 %v3652_v52  ;;  %1690 = vmatpush1.msra.mxu1 %v3653_v54 }
 0x81b   :  { %1620 = vmatprep.subr.mxu0 %v3654_v56  ;;  %1691 = vmatprep.subr.mxu1 %v3655_v9 }
 0x81c   :  { %1621 = vmatpush1.msra.mxu0 %v3656_v8  ;;  %1692 = vmatpush1.msra.mxu1 %v3657_v11 }
 0x81d   :  { %1622 = vmatprep.subr.mxu0 %v3658_v13  ;;  %1693 = vmatprep.subr.mxu1 %v3659_v15 }
 0x81e   :  { %1623 = vmatpush1.msra.mxu0 %v3660_v25  ;;  %1694 = vmatpush1.msra.mxu1 %v3661_v27 }
 0x81f   :  { %1624 = vmatprep.subr.mxu0 %v3662_v36  ;;  %1695 = vmatprep.subr.mxu1 %v3663_v28 }
 0x820   :  { %1625 = vmatpush1.msra.mxu0 %v3664_v34  ;;  %1696 = vmatpush1.msra.mxu1 %v3665_v37 }
 0x821   :  { %1626 = vmatprep.subr.mxu0 %v3666_v23  ;;  %1697 = vmatprep.subr.mxu1 %v3667_v22 }
 0x822   :  { %1627 = vmatpush1.msra.mxu0 %v3668_v5  ;;  %1660 = vmatprep.mubr.f32.mxu0 %v3669_v21 }
 0x823   :  { %1698 = vmatpush1.msra.mxu1 %v3670_v26  ;;  %1731 = vmatprep.mubr.f32.mxu1 %v3669_v21 }
 0x824   :  { %1797 = vmatprep.subr.mxu0 %v3671_v20 }
 0x8c3   :  { %v1532_v18 = vpop.f32.mrf.mxu1  ;;  %v1461_v52 = vpop.f32.mrf.mxu0 }
 0x8c4   :  { %v1462_v13 = vadd.f32 %v1461_v52, %v3539_v48 }
 0x8c5   :  { %v1534_v53 = vpop.f32.mrf.mxu1  ;;  %v1463_v23 = vpop.f32.mrf.mxu0 }
 0x8c6   :  { %v3189_v17 = vadd.f32 %v1534_v53, %v3672_v43  ;;  %v1464_v53 = vadd.f32 %v1463_v23, %v2611_v58 }
 0x8c8   :  { %3673 = vst [vmem:[#allocation45_spill] sm:$0xff] %v3189_v17  ;;  %1546 = vperm.xlu0 %1953, %v3189_v17   ;;  %1539 = vperm.xlu1 %1956, %v3189_v17  }
 0x943   :  { %v1547_v62 = vpop.permute.xlu0 %1546  ;;  %v1540_v16 = vpop.permute.xlu1 %1539 }
 0x944   :  { %v1549_v49 = vmul.f32 %v1547_v62, %v3674_v19  ;;  %v1550_v32 = vmul.f32 %v1547_v62, %v3675_v6  ;;  %v1542_v4 = vmul.f32 %v1540_v16, %v3676_v57  ;;  %v1543_v56 = vmul.f32 %v1540_v16, %v3538_v44 }
 0x946   :  { %v1552_v8 = vadd.f32 %v1549_v49, %v1542_v4  ;;  %v1553_v25 = vadd.f32 %v1550_v32, %v1543_v56  ;;  %v1551_v49 = vmul.f32 %v1547_v62, %v2621_v47  ;;  %v1544_v32 = vmul.f32 %v1540_v16, %v2619_v46 }
 0x948   :  { %v1555_v36 = vadd.f32 %v1552_v8, %v3540_v3  ;;  %v1556_v5 = vadd.f32 %v1553_v25, %v2614_v0  ;;  %v1554_v52 = vadd.f32 %v1551_v49, %v1544_v32  ;;  %v1533_v8 = vadd.f32 %v1532_v18, %v2626_v55 }
 0x94a   :  { %v1575_v34 = vadd.f32 %v1555_v36, %v1462_v13  ;;  %v1582_v6 = vadd.f32 %v1556_v5, %v1464_v53  ;;  %v1557_v25 = vadd.f32 %v1554_v52, %v2628_v45 }
 0x94c   :  { %v1922_v20 = vmul.f32 -1.442695, %v1575_v34  ;;  %v1923_v19 = vmul.f32 -1.442695, %v1582_v6 }
 0x94e   :  { %2009 = vpow2.f32 %v1922_v20 }
 0x94f   :  { %2011 = vpow2.f32 %v1923_v19 }
 0x95b   :  { %v2010_v57 = vpop.eup %2009 }
 0x95c   :  { %v1579_v17 = vadd.f32 1.0, %v2010_v57  ;;  %v2012_v4 = vpop.eup %2011 }
 0x95d   :  { %v1586_v56 = vadd.f32 1.0, %v2012_v4 }
 0x95e   :  { %2013 = vrcp.f32 %v1579_v17 }
 0x95f   :  { %2015 = vrcp.f32 %v1586_v56 }
 0x96b   :  { %v2014_v13 = vpop.eup %2013 }
 0x96c   :  { %v1589_v36 = vmul.f32 %v2014_v13, %v1533_v8  ;;  %v2016_v19 = vpop.eup %2015 }
 0x96d   :  { %v1592_v6 = vsub.f32 1.0, %v2016_v19  ;;  %v1594_v62 = vmul.f32 %v2016_v19, %v3119_v24 }
 0x96e   :  { %v1590_v34 = vadd.f32 %v1589_v36, %v1557_v25 }
 0x970   :  { %2017 = vtanh.f32 %v1590_v34 }
 0x97d   :  { %v2018_v57 = vpop.eup %2017 }
 0x97e   :  { %v1593_v17 = vmul.f32 %v2018_v57, %v1592_v6 }
 0x980   :  { %v3206_v23 = vadd.f32 %v1594_v62, %v1593_v17 }
 0x982   :  { %1661 = vmatmul.mubr.f32.vlgmr.msra.gmra.mxu0 %v3206_v23  ;;  %1732 = vmatmul.mubr.f32.vlgmr.msra.gmra.mxu1 %v3206_v23 }
 0x983   :  { %1798 = vmatpush1.msra.mxu0 %v2918_v30  ;;  %1861 = vmatprep.mubr.f32.mxu0 %v3669_v21  ;;  %v3687_v21 = vld [vmem:[#allocation48_spill] sm:$0xff] }
 0x984   :  { %1799 = vmatprep.subr.mxu0 %v2922_v31 }
 0x985   :  { %1800 = vmatpush1.msra.mxu0 %v2926_v41 }
 0x986   :  { %1801 = vmatprep.subr.mxu0 %v2932_v33  ;;  %v3677_v33 = vld [vmem:[#allocation50_spill] sm:$0xff] }
 0x987   :  { %1802 = vmatpush1.msra.mxu0 %v2938_v38  ;;  %v3678_v38 = vld [vmem:[#allocation46_spill] sm:$0xff] }
 0x988   :  { %1803 = vmatprep.subr.mxu0 %v2944_v7  ;;  %v564_v7 = vrot.slane %v3678_v38, %v3677_v33 }
 0x989   :  { %1804 = vmatpush1.msra.mxu0 %v2950_v51  ;;  %v3679_v51 = vld [vmem:[#allocation47_spill] sm:$0xff] }
 0x98a   :  { %1805 = vmatprep.subr.mxu0 %v2956_v1  ;;  %v557_v1 = vrot.slane %v3678_v38, %v3679_v51 }
 0x98b   :  { %1806 = vmatpush1.msra.mxu0 %v2962_v63  ;;  %v3680_v63 = vld [vmem:[#allocation56_spill] sm:$0xff] }
 0x98c   :  { %1807 = vmatprep.subr.mxu0 %v2968_v50  ;;  %v765_v50 = vrot.slane %v3680_v63, %v3677_v33 }
 0x98d   :  { %1808 = vmatpush1.msra.mxu0 %v2974_v42  ;;  %v758_v42 = vrot.slane %v3680_v63, %v3679_v51 }
 0x98e   :  { %1809 = vmatprep.subr.mxu0 %v2980_v61  ;;  %v3681_v61 = vld [vmem:[#allocation51_spill] sm:$0xff] }
 0x98f   :  { %1810 = vmatpush1.msra.mxu0 %v2986_v2  ;;  %v966_v2 = vrot.slane %v3681_v61, %v3677_v33 }
 0x990   :  { %1811 = vmatprep.subr.mxu0 %v2992_v10  ;;  %v959_v10 = vrot.slane %v3681_v61, %v3679_v51 }
 0x991   :  { %1812 = vmatpush1.msra.mxu0 %v2998_v12  ;;  %v3682_v12 = vld [vmem:[#allocation54_spill] sm:$0xff] }
 0x992   :  { %1813 = vmatprep.subr.mxu0 %v3004_v14  ;;  %v1167_v14 = vrot.slane %v3682_v12, %v3677_v33  ;;  %v1160_v24 = vrot.slane %v3682_v12, %v3679_v51 }
 0x993   :  { %1814 = vmatpush1.msra.mxu0 %v3641_v59  ;;  %v3683_v59 = vld [vmem:[#allocation44_spill] sm:$0xff] }
 0x994   :  { %1815 = vmatprep.subr.mxu0 %v3643_v39  ;;  %v1368_v39 = vrot.slane %v3683_v59, %v3677_v33 }
 0x995   :  { %1816 = vmatpush1.msra.mxu0 %v3645_v29  ;;  %v1361_v29 = vrot.slane %v3683_v59, %v3679_v51 }
 0x996   :  { %1817 = vmatprep.subr.mxu0 %v3647_v35  ;;  %v3684_v35 = vld [vmem:[#allocation45_spill] sm:$0xff] }
 0x997   :  { %1818 = vmatpush1.msra.mxu0 %v3649_v60  ;;  %v1569_v60 = vrot.slane %v3684_v35, %v3677_v33 }
 0x998   :  { %1819 = vmatprep.subr.mxu0 %v3651_v40  ;;  %v1562_v40 = vrot.slane %v3684_v35, %v3679_v51 }
 0x999   :  { %1820 = vmatpush1.msra.mxu0 %v3653_v54 }
 0x99a   :  { %1821 = vmatprep.subr.mxu0 %v3655_v9 }
 0x99b   :  { %1822 = vmatpush1.msra.mxu0 %v3657_v11 }
 0x99c   :  { %1823 = vmatprep.subr.mxu0 %v3659_v15 }
 0x99d   :  { %1824 = vmatpush1.msra.mxu0 %v3661_v27  ;;  %v3685_v27 = vld [vmem:[#allocation49_spill] sm:$0xff] }
 0x99e   :  { %1825 = vmatprep.subr.mxu0 %v3663_v28 }
 0x99f   :  { %1826 = vmatpush1.msra.mxu0 %v3665_v37  ;;  %v3686_v37 = vld [vmem:[#allocation52_spill] sm:$0xff] }
 0x9a0   :  { %1827 = vmatprep.subr.mxu0 %v3667_v22 }
 0x9a1   :  { %1828 = vmatpush1.msra.mxu0 %v3670_v26 }
 0xa42   :  { %v1733_v30 = vpop.f32.mrf.mxu1  ;;  %v1662_v18 = vpop.f32.mrf.mxu0 }
 0xa43   :  { %v1663_v20 = vadd.f32 %v1662_v18, %v3539_v48  ;;  %v1734_v57 = vadd.f32 %v1733_v30, %v2626_v55 }
 0xa44   :  { %v1735_v31 = vpop.f32.mrf.mxu1  ;;  %v1664_v4 = vpop.f32.mrf.mxu0 }
 0xa45   :  { %v1736_v41 = vadd.f32 %v1735_v31, %v3672_v43  ;;  %v1665_v8 = vadd.f32 %v1664_v4, %v2611_v58 }
 0xa47   :  { %1747 = vperm.xlu0 %1953, %v1736_v41   ;;  %1740 = vperm.xlu1 %1956, %v1736_v41   ;;  %v1770_v54 = vrot.slane %v1736_v41, %v3677_v33  ;;  %v1763_v9 = vrot.slane %v1736_v41, %v3679_v51 }
 0xa4b   :  { %566 = vbcast.lane.b32.xlu0 %v564_v7, 256  ;;  %559 = vbcast.lane.b32.xlu1 %v557_v1, 256 }
 0xa4f   :  { %767 = vbcast.lane.b32.xlu0 %v765_v50, 256  ;;  %760 = vbcast.lane.b32.xlu1 %v758_v42, 256 }
 0xa53   :  { %968 = vbcast.lane.b32.xlu0 %v966_v2, 256  ;;  %961 = vbcast.lane.b32.xlu1 %v959_v10, 256 }
 0xa57   :  { %1169 = vbcast.lane.b32.xlu0 %v1167_v14, 256  ;;  %1162 = vbcast.lane.b32.xlu1 %v1160_v24, 256 }
 0xa5b   :  { %1370 = vbcast.lane.b32.xlu0 %v1368_v39, 256  ;;  %1363 = vbcast.lane.b32.xlu1 %v1361_v29, 256  ;;  %v3688_v39 = vlaneseq }
 0xa5d   :  { %v552_v29 = vand.u32 127, %v3688_v39 }
 0xa5f   :  { %1571 = vbcast.lane.b32.xlu0 %v1569_v60, 256  ;;  %1564 = vbcast.lane.b32.xlu1 %v1562_v40, 256  ;;  %vm553_vm3 = vcmp.eq.s32.totalorder %v552_v29, 0  ;;  %vm754_vm4 = vcmp.eq.s32.totalorder %v552_v29, 1  ;;  %vm955_vm5 = vcmp.eq.s32.totalorder %v552_v29, 2  ;;  %vm1156_vm6 = vcmp.eq.s32.totalorder %v552_v29, 3 }
 0xa60   :  { %vm1357_vm7 = vcmp.eq.s32.totalorder %v552_v29, 4  ;;  %vm1558_vm8 = vcmp.eq.s32.totalorder %v552_v29, 5  ;;  %vm1759_vm9 = vcmp.eq.s32.totalorder %v552_v29, 6  ;;  %vm1867_vm10 = vcmp.eq.s32.totalorder %v552_v29, 7 }
 0xa63   :  { %1772 = vbcast.lane.b32.xlu0 %v1770_v54, 256  ;;  %1765 = vbcast.lane.b32.xlu1 %v1763_v9, 256 }
 0xac2   :  { %v1748_v11 = vpop.permute.xlu0 %1747  ;;  %v1741_v15 = vpop.permute.xlu1 %1740 }
 0xac3   :  { %v1750_v28 = vmul.f32 %v1748_v11, %v3685_v27  ;;  %v1751_v22 = vmul.f32 %v1748_v11, %v3686_v37  ;;  %v1743_v26 = vmul.f32 %v1741_v15, %v3687_v21  ;;  %v1744_v16 = vmul.f32 %v1741_v15, %v3538_v44 }
 0xac4   :  { %v1752_v44 = vmul.f32 %v1748_v11, %v2621_v47  ;;  %v1745_v48 = vmul.f32 %v1741_v15, %v2619_v46 }
 0xac5   :  { %v1753_v5 = vadd.f32 %v1750_v28, %v1743_v26  ;;  %v1754_v53 = vadd.f32 %v1751_v22, %v1744_v16 }
 0xac6   :  { %v567_v30 = vpop.permute.xlu0 %566  ;;  %v560_v42 = vpop.permute.xlu1 %559 }
 0xac7   :  { %v1756_v49 = vadd.f32 %v1753_v5, %v3540_v3  ;;  %v1757_v52 = vadd.f32 %v1754_v53, %v2614_v0  ;;  %v1755_v3 = vadd.f32 %v1752_v44, %v1745_v48 }
 0xac9   :  { %v1776_v32 = vadd.f32 %v1756_v49, %v1663_v20  ;;  %v1783_v13 = vadd.f32 %v1757_v52, %v1665_v8  ;;  %v1758_v17 = vadd.f32 %v1755_v3, %v2628_v45 }
 0xaca   :  { %v768_v61 = vpop.permute.xlu0 %767  ;;  %v761_v2 = vpop.permute.xlu1 %760 }
 0xacb   :  { %v1924_v56 = vmul.f32 -1.442695, %v1776_v32  ;;  %v1925_v25 = vmul.f32 -1.442695, %v1783_v13 }
 0xacd   :  { %2019 = vpow2.f32 %v1924_v56 }
 0xace   :  { %2021 = vpow2.f32 %v1925_v25  ;;  %v969_v10 = vpop.permute.xlu0 %968  ;;  %v962_v12 = vpop.permute.xlu1 %961 }
 0xad2   :  { %v1170_v14 = vpop.permute.xlu0 %1169 }
 0xad6   :  { %v1371_v24 = vpop.permute.xlu0 %1370 }
 0xada   :  { %v2020_v36 = vpop.eup %2019  ;;  %v1572_v35 = vpop.permute.xlu0 %1571 }
 0xadb   :  { %v1780_v34 = vadd.f32 1.0, %v2020_v36  ;;  %v2022_v19 = vpop.eup %2021 }
 0xadc   :  { %v1787_v6 = vadd.f32 1.0, %v2022_v19 }
 0xadd   :  { %2023 = vrcp.f32 %v1780_v34 }
 0xade   :  { %2025 = vrcp.f32 %v1787_v6  ;;  %v1773_v11 = vpop.permute.xlu0 %1772 }
 0xaea   :  { %v2024_v0 = vpop.eup %2023 }
 0xaeb   :  { %v1790_v58 = vmul.f32 %v2024_v0, %v1734_v57  ;;  %v2026_v31 = vpop.eup %2025 }
 0xaec   :  { %v1793_v41 = vsub.f32 1.0, %v2026_v31  ;;  %v1795_v47 = vmul.f32 %v2026_v31, %v3206_v23  ;;  %v1163_v23 = vpop.permute.xlu1 %1162 }
 0xaed   :  { %v1791_v62 = vadd.f32 %v1790_v58, %v1758_v17 }
 0xaef   :  { %2027 = vtanh.f32 %v1791_v62 }
 0xaf0   :  { %v1364_v59 = vpop.permute.xlu1 %1363 }
 0xafc   :  { %v2028_v38 = vpop.eup %2027 }
 0xafd   :  { %v1794_v7 = vmul.f32 %v2028_v38, %v1793_v41 }
 0xaff   :  { %v1796_v1 = vadd.f32 %v1795_v47, %v1794_v7 }
 0xb01   :  { %1862 = vmatmul.mubr.f32.vlgmr.msra.gmra.mxu0 %v1796_v1 }
 0xbc1   :  { %v1863_v46 = vpop.f32.mrf.mxu0 }
 0xbc3   :  { %v1864_v63 = vpop.f32.mrf.mxu0 }
 0xbc4   :  { %v1865_v50 = vadd.f32 %v1864_v63, %v3672_v43  ;;  %v1565_v43 = vpop.permute.xlu1 %1564 }
 0xbc6   :  { %v1878_v55 = vrot.slane %v1865_v50, %v3677_v33  ;;  %v1871_v45 = vrot.slane %v1865_v50, %v3679_v51  ;;  %v569_v33 = vsel %vm553_vm3, %v567_v30, 0.0  ;;  %v568_v51 = vsel %vm553_vm3, %v560_v42, 0.0 }
 0xbc7   :  { %v770_v60 = vsel %vm754_vm4, %v768_v61, %v569_v33  ;;  %v769_v40 = vsel %vm754_vm4, %v761_v2, %v568_v51 }
 0xbc8   :  { %1880 = vbcast.lane.b32.xlu0 %v1878_v55, 256  ;;  %1873 = vbcast.lane.b32.xlu1 %v1871_v45, 256  ;;  %v971_v54 = vsel %vm955_vm5, %v969_v10, %v770_v60  ;;  %v970_v9 = vsel %vm955_vm5, %v962_v12, %v769_v40  ;;  %v1766_v15 = vpop.permute.xlu1 %1765 }
 0xbc9   :  { %v1172_v27 = vsel %vm1156_vm6, %v1170_v14, %v971_v54  ;;  %v1171_v28 = vsel %vm1156_vm6, %v1163_v23, %v970_v9 }
 0xbca   :  { %v1373_v37 = vsel %vm1357_vm7, %v1371_v24, %v1172_v27  ;;  %v1372_v22 = vsel %vm1357_vm7, %v1364_v59, %v1171_v28 }
 0xbcb   :  { %v1574_v21 = vsel %vm1558_vm8, %v1572_v35, %v1373_v37  ;;  %v1573_v26 = vsel %vm1558_vm8, %v1565_v43, %v1372_v22 }
 0xbcc   :  { %v1775_v18 = vsel %vm1759_vm9, %v1773_v11, %v1574_v21  ;;  %v1774_v16 = vsel %vm1759_vm9, %v1766_v15, %v1573_v26 }
 0xc3a   :  { %v1881_v5 = vpop.permute.xlu0 %1880  ;;  %v1874_v20 = vpop.permute.xlu1 %1873 }
 0xc3b   :  { %v1883_v53 = vsel %vm1867_vm10, %v1881_v5, %v1775_v18  ;;  %v1882_v49 = vsel %vm1867_vm10, %v1874_v20, %v1774_v16 }
 0xc3c   :  { %1885 = vst [vmem:[#allocation10 + $0x2] sm:$0x3] %v1883_v53  ;;  %1884 = vst [vmem:[#allocation10] sm:$0x3] %v1882_v49 }
 0xc3d   :  { %2184 = shalt.err (!%p2181_p10)
}
 0xc3e   :  { %s2212_s18 = smov 2  }
 0xc3f   :  { %1897 = dma.vmem_to_hbm [thread:$0]  %s1892_s8, 64, %s3300_s9, [#allocation4], %s2206_s28, %s2206_s28, %s2212_s18  }
 0xc40   :  { %2199 = dma.done.wait [#allocation4], 64  }
 0xc41   :  { %2200 = vsyncadd [#allocation4], 4294967232 }
 0xc42   :  { %1901 = vsyncpa [#allocation3], 1 }
 0xc43   :  { %1902 = vsyncpa [#allocation6], 1 }
 0xc44   :  { %1903 = vsyncpa [#allocation9], 1 }
 0xc45   :  { %1904 = vsyncpa [#allocation4], 1 }

</bundles_post_ra>
